<compile_context>
chip_gen: v7x
topology: tpu7x:2x2x1
jax: 0.10.0
libtpu: 0.0.40
codegen_flags: <defaults>
</compile_context>

<pallas_src>
import functools

import jax
import jax.numpy as jnp
from jax import lax
from jax.experimental import pallas as pl
from jax.experimental.pallas import tpu as pltpu

# ----------------------------- configuration (scaled) -----------------------------
ENC_DIM = 16                  # enc_dim
IMG = 64                      # original 224
NUM_CHANNELS = 3
DEC_IN_PLANES = 64            # original 2048
DEC_BASE = 2                  # original 7
NUM_BLOCKS = (1, 1, 1, 2)     # original [3, 4, 6, 3]   # TODO(synk): full depth omitted for runtime
ENC_STEM_CH = 16              # original 64
ENC_STAGE_CH = (16, 32, 64, 128)   # original bottleneck stages output 256/512/1024/2048
ENC_STAGE_STRIDE = (1, 2, 2, 2)
BN_EPS = 1e-5

MXU_DTYPE = jnp.bfloat16      # MXU operand + HBM activation dtype; accumulation stays f32
CONV_ROW_TARGET = 512         # flat LHS rows per in-kernel chunk (single dot => 512 is safe)


# =============================== Pallas kernels ====================================

def _conv_kernel(*refs, offs, ecin, wp2, wo, ho, rows_per_chunk, act, has_res):
    """Fused conv: in-VMEM tap-fused im2col + ONE wide-K MXU matmul per row chunk +
    folded BN/bias FMA + optional residual + activation, writing (ho, wo, Cout) directly.

    refs = (x_ref, w_ref, scale_ref, shift_ref, [res_ref], o_ref, lhs_ref)
      x_ref:     (1, (Hp+1)*Wp, Cin)        flattened zero-padded (and s2d'ed) bf16 input
      w_ref:     (kh*kw*Cin, Cout)          tap-fused bf16 weight matrix
      scale_ref: (1, Cout)                  folded BN scale                (f32)
      shift_ref: (1, Cout)                  folded BN shift + conv bias    (f32)
      res_ref:   (1, ho, wo, Cout)          optional residual (bf16)
      o_ref:     (1, ho, wo, Cout)
      lhs_ref:   (rows_per_chunk*Wp, kh*kw*Cin)  VMEM scratch for the fused LHS (bf16)
    """
    if has_res:
        x_ref, w_ref, scale_ref, shift_ref, res_ref, o_ref, lhs_ref = refs
    else:
        x_ref, w_ref, scale_ref, shift_ref, o_ref, lhs_ref = refs
        res_ref = None
    scale = scale_ref[...]
    shift = shift_ref[...]
    for r0 in range(0, ho, rows_per_chunk):
        rows = min(rows_per_chunk, ho - r0)
        n = rows * wp2
        base = r0 * wp2
        # in-VMEM im2col: one contiguous slice per kernel tap, laid out along K.
        for t, off in enumerate(offs):
            lhs_ref[0:n, t * ecin:(t + 1) * ecin] = x_ref[0, base + off:base + off + n, :]
        # single wide-K matmul (f32 accumulation on the MXU) + folded BN/bias FMA.
        y = jnp.dot(lhs_ref[0:n, :], w_ref[...],
                    preferred_element_type=jnp.float32) * scale + shift
        if res_ref is None:
            if act == "relu":
                y = jnp.maximum(y, 0.0)
            elif act == "sigmoid":
                y = jax.nn.sigmoid(y)
        for r in range(rows):
            row = y[r * wp2:r * wp2 + wo, :]
            if res_ref is not None:
                row = row + res_ref[0, r0 + r, :, :].astype(jnp.float32)
                if act == "relu":
                    row = jnp.maximum(row, 0.0)
                elif act == "sigmoid":
                    row = jax.nn.sigmoid(row)
            o_ref[0, r0 + r, :, :] = row.astype(o_ref.dtype)


def _maxpool_kernel(x_ref, o_ref, *, k, s, hq):
    """Native stride-s max pool on a space-to-depth'ed tile.

    x_ref: (1, s*s*hq, Wq, C)  phase (py,px) occupies rows [(py*s+px)*hq, +hq)
    o_ref: (1, ho, wo, C)
    """
    ho, wo = o_ref.shape[1], o_ref.shape[2]
    out = None
    for dy in range(k):
        qy, py = divmod(dy, s)
        for dx in range(k):
            qx, px = divmod(dx, s)
            r0 = (py * s + px) * hq + qy
            v = x_ref[0, r0:r0 + ho, qx:qx + wo, :]
            out = v if out is None else jnp.maximum(out, v)
    o_ref[0] = out


def _linear_kernel(x_ref, w_ref, b_ref, o_ref):
    o_ref[...] = (jnp.dot(x_ref[...], w_ref[...], preferred_element_type=jnp.float32)
                  + b_ref[...]).astype(o_ref.dtype)


def _vae_head_kernel(x_ref, w_ref, b_ref, eps_ref, mu_ref, logvar_ref, z_ref, *, enc_dim):
    """Fused: global avg-pool + fc + (mu, logvar) split + reparameterize."""
    pooled = jnp.mean(x_ref[...].astype(jnp.float32), axis=1)           # (B, C)
    fc = jnp.dot(pooled, w_ref[...], preferred_element_type=jnp.float32) + b_ref[...]
    mu = fc[:, :enc_dim]
    logvar = fc[:, enc_dim:]
    mu_ref[...] = mu
    logvar_ref[...] = logvar
    z_ref[...] = eps_ref[...] * jnp.exp(logvar * 0.5) + mu               # eps*std + mean


# =============================== wrappers (glue) ====================================

def _s2d_input(x, s, padding):
    """Phase-stack a stride-s conv input so it becomes a stride-1 conv (same bytes)."""
    b, h, w, cin = x.shape
    hp, wp = h + 2 * padding, w + 2 * padding
    hq, wq = -(-hp // s), -(-wp // s)
    xp = jnp.pad(x, ((0, 0), (padding, s * hq - hp + padding),
                     (padding, s * wq - wp + padding), (0, 0)))
    return (xp.reshape(b, hq, s, wq, s, cin)
              .transpose(0, 1, 3, 2, 4, 5)
              .reshape(b, hq, wq, s * s * cin))


def _s2d_weights(kernel, s):
    kh, kw, cin, cout = kernel.shape
    kqh, kqw = -(-kh // s), -(-kw // s)
    wpad = jnp.pad(kernel, ((0, kqh * s - kh), (0, kqw * s - kw), (0, 0), (0, 0)))
    return (wpad.reshape(kqh, s, kqw, s, cin, cout)
                .transpose(0, 2, 1, 3, 4, 5)
                .reshape(kqh, kqw, s * s * cin, cout))


def make_conv_params(kernel, bias=None, bn_scale=None, bn_shift=None, *, stride=1, padding=1):
    """Pre-fold conv bias + BN affine and pre-fuse the kernel taps into ONE bf16
    (kh*kw*Cin, Cout) matrix.  Done once at init; nothing is re-cast inside the forward."""
    kh, kw, _, cout = kernel.shape
    scale = bn_scale if bn_scale is not None else jnp.ones((1, cout), jnp.float32)
    shift = bn_shift if bn_shift is not None else jnp.zeros((1, cout), jnp.float32)
    if bias is not None:
        shift = shift + bias * scale
    wk = kernel if stride == 1 else _s2d_weights(kernel, stride)
    ekh, ekw, ecin, _ = wk.shape
    return {"w": wk.reshape(ekh * ekw * ecin, cout).astype(MXU_DTYPE),
            "scale": scale, "shift": shift,
            "kh": kh, "kw": kw, "stride": stride, "padding": padding,
            "ekh": ekh, "ekw": ekw, "ecin": ecin, "cout": cout}


def conv2d(x, cp, *, act="none", residual=None, out_dtype=MXU_DTYPE):
    """2-D conv (NHWC) with fused BN-affine + bias + optional residual + activation.

    The kernel builds a tap-fused LHS in VMEM and issues one wide-K MXU matmul per row
    chunk; strided convs are lowered to stride-1 via a same-size space-to-depth transform.
    """
    b, h, w, _ = x.shape
    stride, padding = cp["stride"], cp["padding"]
    ekh, ekw, ecin, cout = cp["ekh"], cp["ekw"], cp["ecin"], cp["cout"]
    ho = (h + 2 * padding - cp["kh"]) // stride + 1        # true (PyTorch) output size
    wo = (w + 2 * padding - cp["kw"]) // stride + 1

    x = x.astype(MXU_DTYPE)                                # bf16 activations in HBM
    if stride == 1:
        xp = jnp.pad(x, ((0, 0), (padding, padding), (padding, padding), (0, 0)))
    else:
        # TODO(synk): pad + space-to-depth are still XLA glue copies (one pass each).
        xp = _s2d_input(x, stride, padding)
    _, hp2, wp2, _ = xp.shape
    assert xp.shape[-1] == ecin
    assert hp2 >= ho + ekh - 1 and wp2 >= wo + ekw - 1
    xp = jnp.pad(xp, ((0, 0), (0, 1), (0, 0), (0, 0)))     # slack row: tap reads stay in bounds
    xflat = xp.reshape(b, (hp2 + 1) * wp2, ecin)
    offs = tuple(dy * wp2 + dx for dy in range(ekh) for dx in range(ekw))
    k_dim = ekh * ekw * ecin
    rows_per_chunk = max(1, min(ho, CONV_ROW_TARGET // wp2))

    in_specs = [
        pl.BlockSpec((1, xflat.shape[1], ecin), lambda i: (i, 0, 0)),
        pl.BlockSpec((k_dim, cout), lambda i: (0, 0)),
        pl.BlockSpec((1, cout), lambda i: (0, 0)),
        pl.BlockSpec((1, cout), lambda i: (0, 0)),
    ]
    args = [xflat, cp["w"], cp["scale"], cp["shift"]]
    if residual is not None:
        args.append(residual.astype(MXU_DTYPE))
        in_specs.append(pl.BlockSpec((1, ho, wo, cout), lambda i: (i, 0, 0, 0)))

    return pl.pallas_call(
        functools.partial(_conv_kernel, offs=offs, ecin=ecin, wp2=wp2, wo=wo, ho=ho,
                          rows_per_chunk=rows_per_chunk, act=act,
                          has_res=residual is not None),
        grid=(b,),
        in_specs=in_specs,
        out_specs=pl.BlockSpec((1, ho, wo, cout), lambda i: (i, 0, 0, 0)),
        out_shape=jax.ShapeDtypeStruct((b, ho, wo, cout), out_dtype),
        scratch_shapes=[pltpu.VMEM((rows_per_chunk * wp2, k_dim), MXU_DTYPE)],
        compiler_params=pltpu.CompilerParams(dimension_semantics=("parallel",)),
    )(*args)


def max_pool2d(x, *, kernel_size=3, stride=2, padding=1):
    b, h, w, c = x.shape
    k, s = kernel_size, stride
    ho = (h + 2 * padding - k) // s + 1
    wo = (w + 2 * padding - k) // s + 1
    hp, wp = h + 2 * padding, w + 2 * padding
    hq, wq = -(-hp // s), -(-wp // s)
    assert ho - 1 + (k - 1) // s <= hq - 1 and wo - 1 + (k - 1) // s <= wq - 1
    xp = jnp.pad(x, ((0, 0), (padding, s * hq - hp + padding),
                     (padding, s * wq - wp + padding), (0, 0)),
                 constant_values=-jnp.inf)
    xs = (xp.reshape(b, hq, s, wq, s, c)
            .transpose(0, 2, 4, 1, 3, 5)
            .reshape(b, s * s * hq, wq, c))
    return pl.pallas_call(
        functools.partial(_maxpool_kernel, k=k, s=s, hq=hq),
        grid=(b,),
        in_specs=[pl.BlockSpec((1, s * s * hq, wq, c), lambda i: (i, 0, 0, 0))],
        out_specs=pl.BlockSpec((1, ho, wo, c), lambda i: (i, 0, 0, 0)),
        out_shape=jax.ShapeDtypeStruct((b, ho, wo, c), x.dtype),
        compiler_params=pltpu.CompilerParams(dimension_semantics=("parallel",)),
    )(xs)


def linear(x, w, b):
    return pl.pallas_call(
        _linear_kernel,
        out_shape=jax.ShapeDtypeStruct((x.shape[0], w.shape[1]), jnp.float32))(x, w, b)


def vae_head(feat, fc_w, fc_b, eps):
    """Fused global-avg-pool + fc + mu/logvar split + reparameterize (one tiny launch)."""
    b, h, w, c = feat.shape
    enc_dim = eps.shape[1]
    xf = feat.reshape(b, h * w, c)
    mu, logvar, z = pl.pallas_call(
        functools.partial(_vae_head_kernel, enc_dim=enc_dim),
        out_shape=(jax.ShapeDtypeStruct((b, enc_dim), jnp.float32),
                   jax.ShapeDtypeStruct((b, enc_dim), jnp.float32),
                   jax.ShapeDtypeStruct((b, enc_dim), jnp.float32)),
    )(xf, fc_w, fc_b, eps)
    return mu, logvar, z


def upsample_nearest(x, scale):
    # F.interpolate(mode='nearest', scale_factor=scale) for integer scale == repeat.
    # TODO(synk): fusing this nearest-upsample into the conv kernel's index mapping
    #             (avoiding the 4x HBM intermediate) is left to a future revision.
    return jnp.repeat(jnp.repeat(x, scale, axis=1), scale, axis=2)


# ======================= deterministic parameter initialization ====================

def _init_conv_raw(key, kh, kw, cin, cout, bias):
    kw_, kb = jax.random.split(key)
    w = jax.random.normal(kw_, (kh, kw, cin, cout), jnp.float32) * (2.0 / (kh * kw * cin)) ** 0.5
    b = (0.01 * jax.random.normal(kb, (1, cout), jnp.float32)) if bias else None
    return w, b


def _init_bn(key, c):
    # TODO(synk): BatchNorm2d is applied in inference mode (running_mean=0, running_var=1
    # folded to an affine scale/shift); train-mode batch statistics are not computed.
    k1, k2 = jax.random.split(key)
    gamma = 1.0 + 0.1 * jax.random.normal(k1, (1, c), jnp.float32)
    beta = 0.1 * jax.random.normal(k2, (1, c), jnp.float32)
    scale = gamma / jnp.sqrt(1.0 + BN_EPS)
    shift = beta
    return scale, shift


def _init_linear(key, fin, fout):
    kw_, kb = jax.random.split(key)
    w = jax.random.normal(kw_, (fin, fout), jnp.float32) * (1.0 / fin) ** 0.5
    b = 0.01 * jax.random.normal(kb, (1, fout), jnp.float32)
    return w, b


def init_basic_block_dec(key, in_planes, stride):
    planes = in_planes // stride
    keys = jax.random.split(key, 6)
    w2, _ = _init_conv_raw(keys[0], 3, 3, in_planes, in_planes, bias=False)
    s2, sh2 = _init_bn(keys[1], in_planes)
    p = {"stride": stride,
         "conv2": make_conv_params(w2, None, s2, sh2, stride=1, padding=1)}
    if stride == 1:
        w1, _ = _init_conv_raw(keys[2], 3, 3, in_planes, planes, bias=False)
        s1, sh1 = _init_bn(keys[3], planes)
        p["conv1"] = make_conv_params(w1, None, s1, sh1, stride=1, padding=1)
    else:
        w1, b1 = _init_conv_raw(keys[2], 3, 3, in_planes, planes, bias=True)    # ResizeConv2d conv
        s1, sh1 = _init_bn(keys[3], planes)
        p["conv1"] = make_conv_params(w1, b1, s1, sh1, stride=1, padding=1)
        wsc, bsc = _init_conv_raw(keys[4], 3, 3, in_planes, planes, bias=True)  # shortcut ResizeConv2d
        ssc, shsc = _init_bn(keys[5], planes)
        p["sc_conv"] = make_conv_params(wsc, bsc, ssc, shsc, stride=1, padding=1)
    return p


def _init_layer(key, in_planes, num_blocks, stride):
    strides = [stride] + [1] * (num_blocks - 1)
    bkeys = jax.random.split(key, num_blocks)
    blocks = [init_basic_block_dec(bk, in_planes, s)
              for bk, s in zip(bkeys, reversed(strides))]
    return blocks, in_planes // stride


def init_decoder(key):
    keys = jax.random.split(key, 6)
    p = {}
    p["linear_w"], p["linear_b"] = _init_linear(keys[0], ENC_DIM,
                                                DEC_IN_PLANES * DEC_BASE * DEC_BASE)
    cur = DEC_IN_PLANES
    p["layer4"], cur = _init_layer(keys[1], cur, NUM_BLOCKS[3], 2)
    p["layer3"], cur = _init_layer(keys[2], cur, NUM_BLOCKS[2], 2)
    p["layer2"], cur = _init_layer(keys[3], cur, NUM_BLOCKS[1], 2)
    p["layer1"], cur = _init_layer(keys[4], cur, NUM_BLOCKS[0], 2)
    wf, bf = _init_conv_raw(keys[5], 3, 3, cur, NUM_CHANNELS, bias=True)         # final ResizeConv2d
    p["conv1"] = make_conv_params(wf, bf, None, None, stride=1, padding=1)
    return p


def init_encoder(key):
    # TODO(synk): torchvision resnet50(weights='IMAGENET1K_V1') cannot be loaded here; the
    # encoder backbone is a depth-reduced ResNet-style stack (conv7x7/2 + BN/ReLU + maxpool
    # + 4 conv-BN-ReLU stages + global avgpool) with deterministic random weights, preserving
    # the fc -> (mu, logvar) split semantics of ResNet50Enc.
    keys = jax.random.split(key, 2 + 2 * len(ENC_STAGE_CH) + 1)
    w0, _ = _init_conv_raw(keys[0], 7, 7, NUM_CHANNELS, ENC_STEM_CH, bias=False)
    s0, sh0 = _init_bn(keys[1], ENC_STEM_CH)
    p = {"conv1": make_conv_params(w0, None, s0, sh0, stride=2, padding=3),
         "stages": []}
    cin = ENC_STEM_CH
    for i, (c, s) in enumerate(zip(ENC_STAGE_CH, ENC_STAGE_STRIDE)):
        wi, _ = _init_conv_raw(keys[2 + 2 * i], 3, 3, cin, c, bias=False)
        si, shi = _init_bn(keys[3 + 2 * i], c)
        p["stages"].append({"conv": make_conv_params(wi, None, si, shi, stride=s, padding=1)})
        cin = c
    p["fc_w"], p["fc_b"] = _init_linear(keys[-1], cin, 2 * ENC_DIM)
    return p


# ================================= forward passes ===================================

def basic_block_dec_forward(p, x):
    # out = relu(bn2(conv2(x)))
    out = conv2d(x, p["conv2"], act="relu")
    if p["stride"] == 1:
        # out = relu(bn1(conv1(out)) + x)   -- residual + relu fused in the conv epilogue
        out = conv2d(out, p["conv1"], act="relu", residual=x)
    else:
        # shortcut = BN(ResizeConv2d(x))
        xs = upsample_nearest(x, p["stride"])
        shortcut = conv2d(xs, p["sc_conv"], act="none")
        # out = relu(bn1(ResizeConv2d(out)) + shortcut)
        up = upsample_nearest(out, p["stride"])
        out = conv2d(up, p["conv1"], act="relu", residual=shortcut)
    return out


def decoder_forward(p, z):
    b = z.shape[0]
    x = linear(z, p["linear_w"], p["linear_b"])                      # (B, in_planes*base*base)
    x = x.reshape(b, DEC_IN_PLANES, DEC_BASE, DEC_BASE)              # torch .view -> NCHW
    x = jnp.transpose(x, (0, 2, 3, 1))                               # NCHW -> NHWC for kernels
    for layer in (p["layer4"], p["layer3"], p["layer2"], p["layer1"]):
        for block in layer:
            x = basic_block_dec_forward(block, x)
    x = upsample_nearest(x, 2)                                       # final ResizeConv2d
    x = conv2d(x, p["conv1"], act="sigmoid", out_dtype=jnp.float32)
    x = jnp.transpose(x, (0, 3, 1, 2))                               # NHWC -> NCHW
    return x.reshape(b, NUM_CHANNELS, DEC_BASE * 32, DEC_BASE * 32)  # torch .view


def encoder_forward(p, x_nchw, eps):
    x = jnp.transpose(x_nchw, (0, 2, 3, 1))                          # NCHW -> NHWC
    x = conv2d(x, p["conv1"], act="relu")                            # 7x7 stride-2 stem
    x = max_pool2d(x, kernel_size=3, stride=2, padding=1)
    for st in p["stages"]:
        x = conv2d(x, st["conv"], act="relu")
    # fused: avgpool + fc + split + reparameterize
    mu, logvar, z = vae_head(x, p["fc_w"], p["fc_b"], eps)
    return mu, logvar, z


def var_auto_encoder_forward(params, x, eps):
    mean, logvar, z = encoder_forward(params["encoder"], x, eps)
    x_rec = decoder_forward(params["decoder"], z)
    return x_rec, z, mean, logvar


# ====================================== main =========================================

if __name__ == "__main__":
    key = jax.random.PRNGKey(0)
    kx, keps, kenc, kdec, kc1, kc2, kc3 = jax.random.split(key, 7)

    # sanity checks: tap-fused Pallas conv (stride-1 and space-to-depth stride-2 paths) vs
    # XLA conv on identically bf16-quantized operands; native stride-2 max pool vs
    # lax.reduce_window.
    xt = jax.random.normal(kc1, (2, 9, 11, 7), jnp.float32)            # NHWC, non-square
    xt_q = xt.astype(MXU_DTYPE).astype(jnp.float32)
    for kk, ss, pp, wkey in [(3, 1, 1, kc2), (7, 2, 3, kc3)]:
        wt = jax.random.normal(wkey, (kk, kk, 7, 5), jnp.float32)      # HWIO
        wt_q = wt.astype(MXU_DTYPE).astype(jnp.float32)
        cp = make_conv_params(wt, stride=ss, padding=pp)
        ours = conv2d(xt, cp).astype(jnp.float32)
        ref = lax.conv_general_dilated(
            xt_q, wt_q, (ss, ss), ((pp, pp), (pp, pp)),
            dimension_numbers=("NHWC", "HWIO", "NHWC"),
            precision=lax.Precision.HIGHEST)
        assert jnp.allclose(ours, ref, atol=2e-2, rtol=2e-2), (kk, ss, pp)

    pool_ref = lax.reduce_window(xt, -jnp.inf, lax.max, (1, 3, 3, 1), (1, 2, 2, 1),
                                 ((0, 0), (1, 1), (1, 1), (0, 0)))
    assert jnp.allclose(max_pool2d(xt), pool_ref)

    # inputs (NCHW, like the PyTorch module) and deterministic parameters
    x = jax.random.uniform(kx, (2, NUM_CHANNELS, IMG, IMG), jnp.float32)
    eps = jax.random.normal(keps, (2, ENC_DIM), jnp.float32)           # torch.randn_like(std)
    params = {"encoder": init_encoder(kenc), "decoder": init_decoder(kdec)}

    fwd = jax.jit(lambda xx, ee: var_auto_encoder_forward(params, xx, ee))
    x_rec, z, mean, logvar = fwd(x, eps)
    jax.block_until_ready((x_rec, z, mean, logvar))

    assert x_rec.shape == (2, NUM_CHANNELS, IMG, IMG)
    assert z.shape == (2, ENC_DIM) and mean.shape == (2, ENC_DIM) and logvar.shape == (2, ENC_DIM)
    assert bool(jnp.all(jnp.isfinite(x_rec)))
    assert bool(jnp.all((x_rec >= 0.0) & (x_rec <= 1.0)))              # sigmoid output range
    print("KERNEL_OK")
</pallas_src>

<mosaic_0001>
module attributes {stable_mosaic.version = 11 : i64} {
  func.func @_conv_kernel(%arg0: i32, %arg1: memref<1x156x7xbf16, #tpu.memory_space<vmem>>, %arg2: memref<63x5xbf16, #tpu.memory_space<vmem>>, %arg3: memref<1x5xf32, #tpu.memory_space<vmem>>, %arg4: memref<1x5xf32, #tpu.memory_space<vmem>>, %arg5: memref<1x9x11x5xbf16, #tpu.memory_space<vmem>>, %arg6: memref<117x63xbf16, #tpu.memory_space<vmem>>) attributes {dimension_semantics = [#tpu.dimension_semantics<parallel>], iteration_bounds = array<i64: 2>, scalar_prefetch = 0 : i64, scratch_operands = 1 : i64, tpu.core_type = #tpu.core_type<tc>, window_params = [{transform_indices = @transform_0, window_bounds = array<i64: 1, 156, 7>}, {pipeline_mode = #tpu.pipeline_mode<synchronous>, transform_indices = @transform_1, window_bounds = array<i64: 63, 5>}, {pipeline_mode = #tpu.pipeline_mode<synchronous>, transform_indices = @transform_2, window_bounds = array<i64: 1, 5>}, {pipeline_mode = #tpu.pipeline_mode<synchronous>, transform_indices = @transform_3, window_bounds = array<i64: 1, 5>}, {transform_indices = @transform_4, window_bounds = array<i64: 1, 9, 11, 5>}]} {
    %c0 = arith.constant 0 : index
    %c0_0 = arith.constant 0 : index
    %0 = vector.load %arg3[%c0, %c0_0] : memref<1x5xf32, #tpu.memory_space<vmem>>, vector<1x5xf32>
    %c0_1 = arith.constant 0 : index
    %c0_2 = arith.constant 0 : index
    %1 = vector.load %arg4[%c0_1, %c0_2] : memref<1x5xf32, #tpu.memory_space<vmem>>, vector<1x5xf32>
    %c0_3 = arith.constant 0 : index
    %c0_4 = arith.constant 0 : index
    %c0_5 = arith.constant 0 : index
    %2 = vector.load %arg1[%c0_3, %c0_4, %c0_5] : memref<1x156x7xbf16, #tpu.memory_space<vmem>>, vector<1x117x7xbf16>
    %3 = vector.shape_cast %2 : vector<1x117x7xbf16> to vector<117x7xbf16>
    %c0_6 = arith.constant 0 : index
    %c0_7 = arith.constant 0 : index
    %4 = vector.load %arg6[%c0_6, %c0_7] : memref<117x63xbf16, #tpu.memory_space<vmem>>, vector<117x7xbf16>
    tpu.vector_store %arg6[%c0_6, %c0_7], %3 {strides = array<i32>} : memref<117x63xbf16, #tpu.memory_space<vmem>>, vector<117x7xbf16>,
    %c0_8 = arith.constant 0 : index
    %c1 = arith.constant 1 : index
    %c0_9 = arith.constant 0 : index
    %5 = vector.load %arg1[%c0_8, %c1, %c0_9] : memref<1x156x7xbf16, #tpu.memory_space<vmem>>, vector<1x117x7xbf16>
    %6 = vector.shape_cast %5 : vector<1x117x7xbf16> to vector<117x7xbf16>
    %c0_10 = arith.constant 0 : index
    %c7 = arith.constant 7 : index
    %7 = vector.load %arg6[%c0_10, %c7] : memref<117x63xbf16, #tpu.memory_space<vmem>>, vector<117x7xbf16>
    tpu.vector_store %arg6[%c0_10, %c7], %6 {strides = array<i32>} : memref<117x63xbf16, #tpu.memory_space<vmem>>, vector<117x7xbf16>,
    %c0_11 = arith.constant 0 : index
    %c2 = arith.constant 2 : index
    %c0_12 = arith.constant 0 : index
    %8 = vector.load %arg1[%c0_11, %c2, %c0_12] : memref<1x156x7xbf16, #tpu.memory_space<vmem>>, vector<1x117x7xbf16>
    %9 = vector.shape_cast %8 : vector<1x117x7xbf16> to vector<117x7xbf16>
    %c0_13 = arith.constant 0 : index
    %c14 = arith.constant 14 : index
    %10 = vector.load %arg6[%c0_13, %c14] : memref<117x63xbf16, #tpu.memory_space<vmem>>, vector<117x7xbf16>
    tpu.vector_store %arg6[%c0_13, %c14], %9 {strides = array<i32>} : memref<117x63xbf16, #tpu.memory_space<vmem>>, vector<117x7xbf16>,
    %c0_14 = arith.constant 0 : index
    %c13 = arith.constant 13 : index
    %c0_15 = arith.constant 0 : index
    %11 = vector.load %arg1[%c0_14, %c13, %c0_15] : memref<1x156x7xbf16, #tpu.memory_space<vmem>>, vector<1x117x7xbf16>
    %12 = vector.shape_cast %11 : vector<1x117x7xbf16> to vector<117x7xbf16>
    %c0_16 = arith.constant 0 : index
    %c21 = arith.constant 21 : index
    %13 = vector.load %arg6[%c0_16, %c21] : memref<117x63xbf16, #tpu.memory_space<vmem>>, vector<117x7xbf16>
    tpu.vector_store %arg6[%c0_16, %c21], %12 {strides = array<i32>} : memref<117x63xbf16, #tpu.memory_space<vmem>>, vector<117x7xbf16>,
    %c0_17 = arith.constant 0 : index
    %c14_18 = arith.constant 14 : index
    %c0_19 = arith.constant 0 : index
    %14 = vector.load %arg1[%c0_17, %c14_18, %c0_19] : memref<1x156x7xbf16, #tpu.memory_space<vmem>>, vector<1x117x7xbf16>
    %15 = vector.shape_cast %14 : vector<1x117x7xbf16> to vector<117x7xbf16>
    %c0_20 = arith.constant 0 : index
    %c28 = arith.constant 28 : index
    %16 = vector.load %arg6[%c0_20, %c28] : memref<117x63xbf16, #tpu.memory_space<vmem>>, vector<117x7xbf16>
    tpu.vector_store %arg6[%c0_20, %c28], %15 {strides = array<i32>} : memref<117x63xbf16, #tpu.memory_space<vmem>>, vector<117x7xbf16>,
    %c0_21 = arith.constant 0 : index
    %c15 = arith.constant 15 : index
    %c0_22 = arith.constant 0 : index
    %17 = vector.load %arg1[%c0_21, %c15, %c0_22] : memref<1x156x7xbf16, #tpu.memory_space<vmem>>, vector<1x117x7xbf16>
    %18 = vector.shape_cast %17 : vector<1x117x7xbf16> to vector<117x7xbf16>
    %c0_23 = arith.constant 0 : index
    %c35 = arith.constant 35 : index
    %19 = vector.load %arg6[%c0_23, %c35] : memref<117x63xbf16, #tpu.memory_space<vmem>>, vector<117x7xbf16>
    tpu.vector_store %arg6[%c0_23, %c35], %18 {strides = array<i32>} : memref<117x63xbf16, #tpu.memory_space<vmem>>, vector<117x7xbf16>,
    %c0_24 = arith.constant 0 : index
    %c26 = arith.constant 26 : index
    %c0_25 = arith.constant 0 : index
    %20 = vector.load %arg1[%c0_24, %c26, %c0_25] : memref<1x156x7xbf16, #tpu.memory_space<vmem>>, vector<1x117x7xbf16>
    %21 = vector.shape_cast %20 : vector<1x117x7xbf16> to vector<117x7xbf16>
    %c0_26 = arith.constant 0 : index
    %c42 = arith.constant 42 : index
    %22 = vector.load %arg6[%c0_26, %c42] : memref<117x63xbf16, #tpu.memory_space<vmem>>, vector<117x7xbf16>
    tpu.vector_store %arg6[%c0_26, %c42], %21 {strides = array<i32>} : memref<117x63xbf16, #tpu.memory_space<vmem>>, vector<117x7xbf16>,
    %c0_27 = arith.constant 0 : index
    %c27 = arith.constant 27 : index
    %c0_28 = arith.constant 0 : index
    %23 = vector.load %arg1[%c0_27, %c27, %c0_28] : memref<1x156x7xbf16, #tpu.memory_space<vmem>>, vector<1x117x7xbf16>
    %24 = vector.shape_cast %23 : vector<1x117x7xbf16> to vector<117x7xbf16>
    %c0_29 = arith.constant 0 : index
    %c49 = arith.constant 49 : index
    %25 = vector.load %arg6[%c0_29, %c49] : memref<117x63xbf16, #tpu.memory_space<vmem>>, vector<117x7xbf16>
    tpu.vector_store %arg6[%c0_29, %c49], %24 {strides = array<i32>} : memref<117x63xbf16, #tpu.memory_space<vmem>>, vector<117x7xbf16>,
    %c0_30 = arith.constant 0 : index
    %c28_31 = arith.constant 28 : index
    %c0_32 = arith.constant 0 : index
    %26 = vector.load %arg1[%c0_30, %c28_31, %c0_32] : memref<1x156x7xbf16, #tpu.memory_space<vmem>>, vector<1x117x7xbf16>
    %27 = vector.shape_cast %26 : vector<1x117x7xbf16> to vector<117x7xbf16>
    %c0_33 = arith.constant 0 : index
    %c56 = arith.constant 56 : index
    %28 = vector.load %arg6[%c0_33, %c56] : memref<117x63xbf16, #tpu.memory_space<vmem>>, vector<117x7xbf16>
    tpu.vector_store %arg6[%c0_33, %c56], %27 {strides = array<i32>} : memref<117x63xbf16, #tpu.memory_space<vmem>>, vector<117x7xbf16>,
    %c0_34 = arith.constant 0 : index
    %c0_35 = arith.constant 0 : index
    %29 = vector.load %arg6[%c0_34, %c0_35] : memref<117x63xbf16, #tpu.memory_space<vmem>>, vector<117x63xbf16>
    %c0_36 = arith.constant 0 : index
    %c0_37 = arith.constant 0 : index
    %30 = vector.load %arg2[%c0_36, %c0_37] : memref<63x5xbf16, #tpu.memory_space<vmem>>, vector<63x5xbf16>
    %cst = arith.constant dense<0.000000e+00> : vector<117x5xf32>
    %31 = tpu.matmul %29, %30, %cst {dimension_numbers = #tpu.dot_dimension_numbers<[1], [0], [0], [1], [0, 0, 1, 1], [], []>} : vector<117x63xbf16>, vector<63x5xbf16>, vector<117x5xf32> -> vector<117x5xf32>
    %32 = vector.broadcast %0 : vector<1x5xf32> to vector<117x5xf32>
    %33 = arith.mulf %31, %32 : vector<117x5xf32>
    %34 = vector.broadcast %1 : vector<1x5xf32> to vector<117x5xf32>
    %35 = arith.addf %33, %34 : vector<117x5xf32>
    %36 = vector.extract_strided_slice %35 {offsets = [0, 0], sizes = [11, 5], strides = [1, 1]} : vector<117x5xf32> to vector<11x5xf32>
    %37 = arith.truncf %36 : vector<11x5xf32> to vector<11x5xbf16>
    %c0_38 = arith.constant 0 : index
    %c0_39 = arith.constant 0 : index
    %c0_40 = arith.constant 0 : index
    %c0_41 = arith.constant 0 : index
    %38 = vector.load %arg5[%c0_38, %c0_39, %c0_40, %c0_41] : memref<1x9x11x5xbf16, #tpu.memory_space<vmem>>, vector<1x1x11x5xbf16>
    %39 = vector.shape_cast %38 : vector<1x1x11x5xbf16> to vector<11x5xbf16>
    %40 = vector.shape_cast %37 : vector<11x5xbf16> to vector<1x1x11x5xbf16>
    tpu.vector_store %arg5[%c0_38, %c0_39, %c0_40, %c0_41], %40 {strides = array<i32>} : memref<1x9x11x5xbf16, #tpu.memory_space<vmem>>, vector<1x1x11x5xbf16>,
    %41 = vector.extract_strided_slice %35 {offsets = [13, 0], sizes = [11, 5], strides = [1, 1]} : vector<117x5xf32> to vector<11x5xf32>
    %42 = arith.truncf %41 : vector<11x5xf32> to vector<11x5xbf16>
    %c0_42 = arith.constant 0 : index
    %c1_43 = arith.constant 1 : index
    %c0_44 = arith.constant 0 : index
    %c0_45 = arith.constant 0 : index
    %43 = vector.load %arg5[%c0_42, %c1_43, %c0_44, %c0_45] : memref<1x9x11x5xbf16, #tpu.memory_space<vmem>>, vector<1x1x11x5xbf16>
    %44 = vector.shape_cast %43 : vector<1x1x11x5xbf16> to vector<11x5xbf16>
    %45 = vector.shape_cast %42 : vector<11x5xbf16> to vector<1x1x11x5xbf16>
    tpu.vector_store %arg5[%c0_42, %c1_43, %c0_44, %c0_45], %45 {strides = array<i32>} : memref<1x9x11x5xbf16, #tpu.memory_space<vmem>>, vector<1x1x11x5xbf16>,
    %46 = vector.extract_strided_slice %35 {offsets = [26, 0], sizes = [11, 5], strides = [1, 1]} : vector<117x5xf32> to vector<11x5xf32>
    %47 = arith.truncf %46 : vector<11x5xf32> to vector<11x5xbf16>
    %c0_46 = arith.constant 0 : index
    %c2_47 = arith.constant 2 : index
    %c0_48 = arith.constant 0 : index
    %c0_49 = arith.constant 0 : index
    %48 = vector.load %arg5[%c0_46, %c2_47, %c0_48, %c0_49] : memref<1x9x11x5xbf16, #tpu.memory_space<vmem>>, vector<1x1x11x5xbf16>
    %49 = vector.shape_cast %48 : vector<1x1x11x5xbf16> to vector<11x5xbf16>
    %50 = vector.shape_cast %47 : vector<11x5xbf16> to vector<1x1x11x5xbf16>
    tpu.vector_store %arg5[%c0_46, %c2_47, %c0_48, %c0_49], %50 {strides = array<i32>} : memref<1x9x11x5xbf16, #tpu.memory_space<vmem>>, vector<1x1x11x5xbf16>,
    %51 = vector.extract_strided_slice %35 {offsets = [39, 0], sizes = [11, 5], strides = [1, 1]} : vector<117x5xf32> to vector<11x5xf32>
    %52 = arith.truncf %51 : vector<11x5xf32> to vector<11x5xbf16>
    %c0_50 = arith.constant 0 : index
    %c3 = arith.constant 3 : index
    %c0_51 = arith.constant 0 : index
    %c0_52 = arith.constant 0 : index
    %53 = vector.load %arg5[%c0_50, %c3, %c0_51, %c0_52] : memref<1x9x11x5xbf16, #tpu.memory_space<vmem>>, vector<1x1x11x5xbf16>
    %54 = vector.shape_cast %53 : vector<1x1x11x5xbf16> to vector<11x5xbf16>
    %55 = vector.shape_cast %52 : vector<11x5xbf16> to vector<1x1x11x5xbf16>
    tpu.vector_store %arg5[%c0_50, %c3, %c0_51, %c0_52], %55 {strides = array<i32>} : memref<1x9x11x5xbf16, #tpu.memory_space<vmem>>, vector<1x1x11x5xbf16>,
    %56 = vector.extract_strided_slice %35 {offsets = [52, 0], sizes = [11, 5], strides = [1, 1]} : vector<117x5xf32> to vector<11x5xf32>
    %57 = arith.truncf %56 : vector<11x5xf32> to vector<11x5xbf16>
    %c0_53 = arith.constant 0 : index
    %c4 = arith.constant 4 : index
    %c0_54 = arith.constant 0 : index
    %c0_55 = arith.constant 0 : index
    %58 = vector.load %arg5[%c0_53, %c4, %c0_54, %c0_55] : memref<1x9x11x5xbf16, #tpu.memory_space<vmem>>, vector<1x1x11x5xbf16>
    %59 = vector.shape_cast %58 : vector<1x1x11x5xbf16> to vector<11x5xbf16>
    %60 = vector.shape_cast %57 : vector<11x5xbf16> to vector<1x1x11x5xbf16>
    tpu.vector_store %arg5[%c0_53, %c4, %c0_54, %c0_55], %60 {strides = array<i32>} : memref<1x9x11x5xbf16, #tpu.memory_space<vmem>>, vector<1x1x11x5xbf16>,
    %61 = vector.extract_strided_slice %35 {offsets = [65, 0], sizes = [11, 5], strides = [1, 1]} : vector<117x5xf32> to vector<11x5xf32>
    %62 = arith.truncf %61 : vector<11x5xf32> to vector<11x5xbf16>
    %c0_56 = arith.constant 0 : index
    %c5 = arith.constant 5 : index
    %c0_57 = arith.constant 0 : index
    %c0_58 = arith.constant 0 : index
    %63 = vector.load %arg5[%c0_56, %c5, %c0_57, %c0_58] : memref<1x9x11x5xbf16, #tpu.memory_space<vmem>>, vector<1x1x11x5xbf16>
    %64 = vector.shape_cast %63 : vector<1x1x11x5xbf16> to vector<11x5xbf16>
    %65 = vector.shape_cast %62 : vector<11x5xbf16> to vector<1x1x11x5xbf16>
    tpu.vector_store %arg5[%c0_56, %c5, %c0_57, %c0_58], %65 {strides = array<i32>} : memref<1x9x11x5xbf16, #tpu.memory_space<vmem>>, vector<1x1x11x5xbf16>,
    %66 = vector.extract_strided_slice %35 {offsets = [78, 0], sizes = [11, 5], strides = [1, 1]} : vector<117x5xf32> to vector<11x5xf32>
    %67 = arith.truncf %66 : vector<11x5xf32> to vector<11x5xbf16>
    %c0_59 = arith.constant 0 : index
    %c6 = arith.constant 6 : index
    %c0_60 = arith.constant 0 : index
    %c0_61 = arith.constant 0 : index
    %68 = vector.load %arg5[%c0_59, %c6, %c0_60, %c0_61] : memref<1x9x11x5xbf16, #tpu.memory_space<vmem>>, vector<1x1x11x5xbf16>
    %69 = vector.shape_cast %68 : vector<1x1x11x5xbf16> to vector<11x5xbf16>
    %70 = vector.shape_cast %67 : vector<11x5xbf16> to vector<1x1x11x5xbf16>
    tpu.vector_store %arg5[%c0_59, %c6, %c0_60, %c0_61], %70 {strides = array<i32>} : memref<1x9x11x5xbf16, #tpu.memory_space<vmem>>, vector<1x1x11x5xbf16>,
    %71 = vector.extract_strided_slice %35 {offsets = [91, 0], sizes = [11, 5], strides = [1, 1]} : vector<117x5xf32> to vector<11x5xf32>
    %72 = arith.truncf %71 : vector<11x5xf32> to vector<11x5xbf16>
    %c0_62 = arith.constant 0 : index
    %c7_63 = arith.constant 7 : index
    %c0_64 = arith.constant 0 : index
    %c0_65 = arith.constant 0 : index
    %73 = vector.load %arg5[%c0_62, %c7_63, %c0_64, %c0_65] : memref<1x9x11x5xbf16, #tpu.memory_space<vmem>>, vector<1x1x11x5xbf16>
    %74 = vector.shape_cast %73 : vector<1x1x11x5xbf16> to vector<11x5xbf16>
    %75 = vector.shape_cast %72 : vector<11x5xbf16> to vector<1x1x11x5xbf16>
    tpu.vector_store %arg5[%c0_62, %c7_63, %c0_64, %c0_65], %75 {strides = array<i32>} : memref<1x9x11x5xbf16, #tpu.memory_space<vmem>>, vector<1x1x11x5xbf16>,
    %76 = vector.extract_strided_slice %35 {offsets = [104, 0], sizes = [11, 5], strides = [1, 1]} : vector<117x5xf32> to vector<11x5xf32>
    %77 = arith.truncf %76 : vector<11x5xf32> to vector<11x5xbf16>
    %c0_66 = arith.constant 0 : index
    %c8 = arith.constant 8 : index
    %c0_67 = arith.constant 0 : index
    %c0_68 = arith.constant 0 : index
    %78 = vector.load %arg5[%c0_66, %c8, %c0_67, %c0_68] : memref<1x9x11x5xbf16, #tpu.memory_space<vmem>>, vector<1x1x11x5xbf16>
    %79 = vector.shape_cast %78 : vector<1x1x11x5xbf16> to vector<11x5xbf16>
    %80 = vector.shape_cast %77 : vector<11x5xbf16> to vector<1x1x11x5xbf16>
    tpu.vector_store %arg5[%c0_66, %c8, %c0_67, %c0_68], %80 {strides = array<i32>} : memref<1x9x11x5xbf16, #tpu.memory_space<vmem>>, vector<1x1x11x5xbf16>,
    return
  }
  func.func @transform_0(%arg0: i32) -> (i32, i32, i32) {
    %c0_i32 = arith.constant 0 : i32
    %c0_i32_0 = arith.constant 0 : i32
    %c0_i32_1 = arith.constant 0 : i32
    return %arg0, %c0_i32, %c0_i32_0 : i32, i32, i32
  }
  func.func @transform_1(%arg0: i32) -> (i32, i32) {
    %c0_i32 = arith.constant 0 : i32
    %c0_i32_0 = arith.constant 0 : i32
    %c0_i32_1 = arith.constant 0 : i32
    return %c0_i32, %c0_i32_0 : i32, i32
  }
  func.func @transform_2(%arg0: i32) -> (i32, i32) {
    %c0_i32 = arith.constant 0 : i32
    %c0_i32_0 = arith.constant 0 : i32
    %c0_i32_1 = arith.constant 0 : i32
    return %c0_i32, %c0_i32_0 : i32, i32
  }
  func.func @transform_3(%arg0: i32) -> (i32, i32) {
    %c0_i32 = arith.constant 0 : i32
    %c0_i32_0 = arith.constant 0 : i32
    %c0_i32_1 = arith.constant 0 : i32
    return %c0_i32, %c0_i32_0 : i32, i32
  }
  func.func @transform_4(%arg0: i32) -> (i32, i32, i32, i32) {
    %c0_i32 = arith.constant 0 : i32
    %c0_i32_0 = arith.constant 0 : i32
    %c0_i32_1 = arith.constant 0 : i32
    %c0_i32_2 = arith.constant 0 : i32
    return %arg0, %c0_i32, %c0_i32_0, %c0_i32_1 : i32, i32, i32, i32
  }
}

</mosaic_0001>

<bundles_post_ra>
// kernel: tpu_custom_call.1
= control target key start
LH: loop header
LB: loop body
LE: loop exit
PB: predicated region body
PF: predicated region fallthrough
CT: control target
= control target key end

     0   :  { %s2493_s15 = smov 0   ;;  %s3651_s0 = inlined_call_operand.vmem [shape: bf16[2,156,7], index: 0, kind: input, shape index: {}]   ;;  %s3652_s1 = inlined_call_operand.vmem [shape: bf16[63,5], index: 1, kind: input, shape index: {}]   ;;  %s3653_s2 = inlined_call_operand.vmem [shape: f32[1,5], index: 2, kind: input, shape index: {}]   ;;  %s3654_s3 = inlined_call_operand.vmem [shape: f32[1,5], index: 3, kind: input, shape index: {}]   ;;  %s3655_s4 = inlined_call_operand.vmem [shape: bf16[2,9,11,5], index: 4, kind: output, shape index: {}]  }
   0x1 LB: > { %s2270_s16 = sadd.s32 4294967295, %s2457_s15   ;;  %p2274_p0 = scmp.ge.s32.totalorder %s2457_s15, 1  ;;  %s2457_s15 = sphi %s2493_s15, %s14_s15  }
   0x2   : > { %p162_p1 = scmp.lt.s32.totalorder %s2457_s15, 3 }
   0x4   : > { %p163_p2 = pnand %p2274_p0, %p162_p1 }
   0x5   : > { %p188_p3 = scmp.lt.s32.totalorder (!%p163_p2), %s2270_s16, 1  ;;  %vm885_vm0 = vcmask (!%p163_p2), 1040384   ;;  %vm886_vm1 = vcmask (!%p163_p2), 1044484   ;;  %vm1015_vm2 = vsmask.f32 (!%p163_p2), 256  ;;  %s2459_s21 = smov (!%p163_p2), 42  }
   0x6   : > { %166 = sbr.rel (%p163_p2) target bundleno = 617 (0x269), region = 36  ;;  %vm1016_vm3 = vsmask.f32 (!%p163_p2), 4368  ;;  %vm3669_vm4 = vsmask.f32 (!%p163_p2), 1280  ;;  %vm2522_vm6 = vmor (!%p163_p2), %vm885_vm0, %vm886_vm1  ;;  %s2460_s22 = smov (!%p163_p2), 14  }
   0x7   : > { %vm628_vm5 = vsmask.f32 (!%p163_p2), 5392  ;;  %vm252_vm7 = vsmask.f32 (!%p163_p2), 3328  ;;  %vm253_vm8 = vsmask.f32 (!%p163_p2), 7440  ;;  %vm2546_vm9 = vmor (!%p163_p2), %vm1015_vm2, %vm1016_vm3 }
   0x8   : > { %s2461_s23 = smov (!%p163_p2), 28   ;;  %vm2560_vm10 = vmor (!%p163_p2), %vm3669_vm4, %vm628_vm5  ;;  %s2462_s24 = smov (!%p163_p2), 35   ;;  %vm499_vm12 = vcmask (!%p163_p2), 1042432   ;;  %vm500_vm13 = vcmask (!%p163_p2), 1046532   ;;  %vm231_vm15 = vcmask (!%p163_p2), 51200   ;;  %vm216_vm2 = vcmask (!%p163_p2), 52224  }
   0x9   : > { %s2463_s25 = smov (!%p163_p2), 21   ;;  %vm2581_vm11 = vmor (!%p163_p2), %vm252_vm7, %vm253_vm8  ;;  %s2464_s26 = smov (!%p163_p2), 7   ;;  %vm3673_vm0 = vsmask.f32 (!%p163_p2), 2304  ;;  %vm1376_vm3 = vsmask.f32 (!%p163_p2), 6416 }
   0xa   : > { %vm2621_vm14 = vmor (!%p163_p2), %vm499_vm12, %vm500_vm13  ;;  %s2465_s27 = smov (!%p163_p2), 49   ;;  %vm1624_vm7 = vcmask (!%p163_p2), 1041408   ;;  %vm1625_vm8 = vcmask (!%p163_p2), 1045508   ;;  %vm464_vm13 = vcmask (!%p163_p2), 108600   ;;  %s2466_s30 = smov (!%p163_p2), 56   ;;  %vm1718_vm4 = vcmask (!%p163_p2), 511424  }
   0xb   : > { %vm2834_vm1 = vmand (!%p163_p2), %vm231_vm15, %vm3673_vm0 }
   0xc   : > { %vm2931_vm5 = vmor (!%p163_p2), %vm3673_vm0, %vm1376_vm3  ;;  %vm606_vm3 = vcmask (!%p163_p2), 166000  }
   0xd   : > { %s3736_s16 = smov (!%p188_p3, %s2270_s16), 1  ;;  %vm2993_vm12 = vmor %vm1624_vm7, %vm1625_vm8  ;;  %vm848_vm8 = vcmask 223400  }
   0xe   : > { %s2418_s17 = smul.u32 80, %s3736_s16  ;;  %vm3027_vm15 = vmand %vm464_vm13, %vm3673_vm0  ;;  %vm591_vm13 = vcmask 167024  }
   0xf   : > { %vm3083_vm7 = vmand %vm606_vm3, %vm3673_vm0  ;;  %vm1847_vm3 = vcmask 1046528   ;;  %s2419_s13 = smul.u32 72, %s3736_s16 }
  0x10   : > { %s2507_s20 = scalar_lea.vmem %s3651_s0, %s2418_s17 }
  0x11   : > { %v2510_v0 = vld [vmem:[%s2507_s20 + $0x44] sm:$0xf]  ;;  %v2513_v1 = vld [vmem:[%s2507_s20 + $0x38] sm:$0xf]  ;;  %v2516_v2 = vld [vmem:[%s2507_s20 + $0x3c] sm:$0xf]  ;;  %s3536_s16 = scalar_lea.vmem %s3655_s4, %s2419_s13 }
  0x12   : > { %v3656_v3 = vrot.slane %v2510_v0, 5  ;;  %v3661_v4 = vrot.slane %v2513_v1, 5  ;;  %v868_v5 = vld [vmem:[%s2507_s20 + $0x40] sm:$0x3]  ;;  %v3657_v6 = vrot.slane %v2516_v2, 7 }
  0x13   : > { %v932_v8 = vrot.slane %v868_v5, 7  ;;  %v1013_v9 = vld [vmem:[%s2507_s20 + $0x3c] sm:$0xf]  ;;  %v1014_v10 = vld [vmem:[%s2507_s20 + $0x40] sm:$0x3] }
  0x14   : > { %v1295_v11 = vrot.slane %v3656_v3, 4  ;;  %v545_v12 = vrot.slane %v3661_v4, 4  ;;  %v931_v13 = vrot.slane %v3657_v6, 4  ;;  %v1141_v14 = vshrl.u32 %v1013_v9, 16  ;;  %v625_v15 = vld [vmem:[%s2507_s20 + $0x3c] sm:$0xf] }
  0x15   : > { %v1150_v16 = vshrl.u32 %v1014_v10, 16  ;;  %v1153_v17 = vshll.u32 %v1014_v10, 16  ;;  %v626_v18 = vld [vmem:[%s2507_s20 + $0x40] sm:$0x1]  ;;  %v770_v19 = vshrl.u32 %v625_v15, 16  ;;  %v773_v20 = vshll.u32 %v625_v15, 16 }
  0x16   : > { %1324 = vrot.lane.b32.xlu1 %v1295_v11, %s2459_s21  ;;  %574 = vrot.lane.b32.xlu0 %v545_v12, %s2460_s22  ;;  %v933_v21 = vsel %vm2522_vm6, %v931_v13, %v932_v8  ;;  %v2540_v22 = vrot.slane %v1141_v14, 7  ;;  %v780_v23 = vshrl.u32 %v626_v18, 16  ;;  %v783_v24 = vshll.u32 %v626_v18, 16  ;;  %v251_v25 = vld [vmem:[%s2507_s20 + $0x38] sm:$0x7] }
  0x17   : > { %v1152_v26 = vrot.slane %v1150_v16, 7  ;;  %v772_v27 = vrot.slane %v770_v19, 6  ;;  %v775_v28 = vrot.slane %v773_v20, 7  ;;  %v395_v29 = vshll.u32 %v251_v25, 16  ;;  %v238_v30 = vld [vmem:[%s2507_s20 + $0x4] sm:$0xf] }
  0x18   : > { %v1148_v32 = vrot.slane %v2540_v22, 4  ;;  %v782_v33 = vrot.slane %v780_v23, 6  ;;  %v785_v34 = vrot.slane %v783_v24, 7  ;;  %v399_v35 = vshrl.u32 %v251_v25, 16  ;;  %v239_v36 = vld [vmem:[%s2507_s20 + $0x8] sm:$0xf] }
  0x19   : > { %v1155_v37 = vor.u32 %v1153_v17, %v1152_v26  ;;  %v2552_v38 = vor.u32 %v775_v28, %v772_v27  ;;  %v2554_v39 = vrot.slane %v395_v29, 5  ;;  %v265_v40 = vshll.u32 %v238_v30, 16  ;;  %v237_v41 = vld [vmem:[%s2507_s20] sm:$0xf]  ;;  %v240_v47 = vld [vmem:[%s2507_s20 + $0xc] sm:$0xf] }
  0x1a   : > { %962 = vrot.lane.b32.xlu1 %v933_v21, %s2461_s23  ;;  %v786_v43 = vor.u32 %v785_v34, %v782_v33  ;;  %v401_v44 = vrot.slane %v399_v35, 4  ;;  %v269_v45 = vshrl.u32 %v238_v30, 16  ;;  %v275_v46 = vshll.u32 %v239_v36, 16  ;;  %v2569_v52 = vld [vmem:[%s2507_s20 + $0x10] sm:$0xf] }
  0x1b   : > { %v1156_v48 = vsel %vm2546_vm9, %v1148_v32, %v1155_v37  ;;  %v778_v49 = vrot.slane %v2552_v38, 4  ;;  %v267_v50 = vrot.slane %v265_v40, 5  ;;  %v279_v51 = vshrl.u32 %v239_v36, 16  ;;  %v246_v61 = vld [vmem:[%s2507_s20 + $0x24] sm:$0xf] }
  0x1c   : > { %1185 = vrot.lane.b32.xlu0 %v1156_v48, %s2462_s24  ;;  %v402_v53 = vor.u32 %v401_v44, %v2554_v39  ;;  %v271_v54 = vrot.slane %v269_v45, 4  ;;  %v277_v55 = vrot.slane %v275_v46, 5  ;;  %v256_v56 = vshrl.u32 %v237_v41, 16  ;;  %v247_v9 = vld [vmem:[%s2507_s20 + $0x28] sm:$0xf] }
  0x1d   : > { %v787_v57 = vsel %vm2560_vm10, %v778_v49, %v786_v43  ;;  %v259_v58 = vshll.u32 %v237_v41, 16  ;;  %v285_v59 = vshll.u32 %v240_v47, 16  ;;  %v289_v60 = vshrl.u32 %v240_v47, 16  ;;  %v245_v23 = vld [vmem:[%s2507_s20 + $0x20] sm:$0xf] }
  0x1e   : > { %816 = vrot.lane.b32.xlu1 %v787_v57, %s2463_s25  ;;  %v403_v62 = vrot.slane %v402_v53, 4  ;;  %v272_v63 = vor.u32 %v271_v54, %v267_v50  ;;  %v258_v5 = vrot.slane %v256_v56, 4  ;;  %v295_v8 = vshll.u32 %v2569_v52, 16  ;;  %v2590_v24 = vld [vmem:[%s2507_s20 + $0x4] sm:$0xf] }
  0x1f   : > { %v261_v11 = vrot.slane %v259_v58, 5  ;;  %v287_v12 = vrot.slane %v285_v59, 5  ;;  %v291_v13 = vrot.slane %v289_v60, 4  ;;  %v281_v16 = vrot.slane %v279_v51, 4  ;;  %v248_v36 = vld [vmem:[%s2507_s20 + $0x2c] sm:$0xf] }
  0x20   : > { %432 = vrot.lane.b32.xlu0 %v403_v62, %s2464_s26  ;;  %v273_v14 = vrot.slane %v272_v63, 4  ;;  %v2586_v15 = vrot.slane %v295_v8, 5  ;;  %v345_v17 = vshll.u32 %v246_v61, 16  ;;  %v349_v20 = vshrl.u32 %v246_v61, 16  ;;  %v471_v44 = vld [vmem:[%s2507_s20 + $0x8] sm:$0xf] }
  0x21   : > { %v262_v18 = vor.u32 %v261_v11, %v258_v5  ;;  %v292_v19 = vor.u32 %v291_v13, %v287_v12  ;;  %v355_v21 = vshll.u32 %v247_v9, 16  ;;  %v282_v26 = vor.u32 %v281_v16, %v277_v55  ;;  %v2604_v45 = vld [vmem:[%s2507_s20 + $0x30] sm:$0xf]  ;;  %v2613_v54 = vld [vmem:[%s2507_s20 + $0xc] sm:$0xf] }
  0x22   : > { %v278_v25 = vsel %vm2581_vm11, %v273_v14, %v277_v55  ;;  %v347_v27 = vrot.slane %v345_v17, 5  ;;  %v351_v30 = vrot.slane %v349_v20, 4  ;;  %v335_v33 = vshll.u32 %v245_v23, 16  ;;  %v469_v58 = vld [vmem:[%s2507_s20] sm:$0xe] }
  0x23   : > { %406 = vrot.lane.b32.xlu1 %v278_v25, %s2464_s26  ;;  %v263_v28 = vrot.slane %v262_v18, 4  ;;  %v293_v29 = vrot.slane %v292_v19, 4  ;;  %v283_v32 = vrot.slane %v282_v26, 4  ;;  %v339_v34 = vshrl.u32 %v245_v23, 16  ;;  %v2634_v16 = vld [vmem:[%s2507_s20 + $0x24] sm:$0xf] }
  0x24   : > { %v504_v35 = vrot.slane %v2590_v24, 5  ;;  %v352_v41 = vor.u32 %v351_v30, %v347_v27  ;;  %v357_v43 = vrot.slane %v355_v21, 5  ;;  %v359_v46 = vshrl.u32 %v247_v9, 16  ;;  %v2627_v9 = vld [vmem:[%s2507_s20 + $0x10] sm:$0xf] }
  0x25   : > { %v268_v37 = vsel %vm2581_vm11, %v263_v28, %v267_v50  ;;  %v298_v40 = vsel %vm2581_vm11, %v293_v29, %v2586_v15  ;;  %v2607_v47 = vrot.slane %v335_v33, 5  ;;  %v341_v48 = vrot.slane %v339_v34, 4  ;;  %v612_v17 = vld [vmem:[%s2507_s20 + $0x8] sm:$0xf]  ;;  %v2643_v24 = vld [vmem:[%s2507_s20 + $0x20] sm:$0xf] }
  0x26   : > { %404 = vrot.lane.b32.xlu0 %v268_v37, %s2464_s26  ;;  %v288_v49 = vsel %vm2581_vm11, %v283_v32, %v287_v12  ;;  %v353_v50 = vrot.slane %v352_v41, 4  ;;  %v365_v51 = vshll.u32 %v248_v36, 16  ;;  %v369_v53 = vshrl.u32 %v248_v36, 16  ;;  %v613_v25 = vld [vmem:[%s2507_s20 + $0xc] sm:$0xf] }
  0x27   : > { %410 = vrot.lane.b32.xlu1 %v298_v40, %s2464_s26  ;;  %v342_v55 = vor.u32 %v341_v48, %v2607_v47  ;;  %v506_v56 = vrot.slane %v504_v35, 4  ;;  %v507_v57 = vrot.slane %v471_v44, 5  ;;  %v375_v59 = vshll.u32 %v2604_v45, 16  ;;  %v479_v36 = vld [vmem:[%s2507_s20 + $0x28] sm:$0xf] }
  0x28   : > { %v358_v60 = vsel %vm2581_vm11, %v353_v50, %v357_v43  ;;  %v367_v62 = vrot.slane %v365_v51, 5  ;;  %v371_v63 = vrot.slane %v369_v53, 4  ;;  %v361_v8 = vrot.slane %v359_v46, 4  ;;  %v614_v44 = vld [vmem:[%s2507_s20 + $0x10] sm:$0xf] }
  0x29   : > { %v343_v5 = vrot.slane %v342_v55, 4  ;;  %v510_v11 = vrot.slane %v2613_v54, 5  ;;  %v2277_v12 = vrot.slane %v469_v58, 9  ;;  %v2631_v14 = vrot.slane %v375_v59, 5  ;;  %v615_v54 = vld [vmem:[%s2507_s20 + $0x14] sm:$0xf] }
  0x2a   : > { %408 = vrot.lane.b32.xlu0 %v288_v49, %s2464_s26  ;;  %v372_v13 = vor.u32 %v371_v63, %v367_v62  ;;  %v508_v19 = vsel %vm2621_vm14, %v506_v56, %v507_v57  ;;  %v362_v20 = vor.u32 %v361_v8, %v357_v43  ;;  %v3667_v23 = vrot.slane %v2627_v9, 5  ;;  %v204_v3 = vld [vmem:[%s2507_s20 + $0xc] sm:$0xf]  ;;  %v203_v6 = vld [vmem:[%s2507_s20 + $0x8] sm:$0xf] }
  0x2b   : > { %422 = vrot.lane.b32.xlu1 %v358_v60, %s2464_s26  ;;  %v348_v18 = vsel %vm2581_vm11, %v343_v5, %v347_v27  ;;  %v512_v26 = vrot.slane %v510_v11, 4  ;;  %v528_v28 = vrot.slane %v2634_v16, 5  ;;  %v640_v29 = vshrl.u32 %v612_v17, 16  ;;  %v611_v27 = vld [vmem:[%s2507_s20 + $0x4] sm:$0xc] }
  0x2c   : > { %v373_v21 = vrot.slane %v372_v13, 4  ;;  %v643_v30 = vshll.u32 %v612_v17, 16  ;;  %v505_v32 = vsel %vm2621_vm14, %v2277_v12, %v504_v35  ;;  %v363_v34 = vrot.slane %v362_v20, 4  ;;  %v620_v12 = vld [vmem:[%s2507_s20 + $0x28] sm:$0xf] }
  0x2d   : > { %v642_v37 = vrot.slane %v640_v29, 6  ;;  %v650_v41 = vshrl.u32 %v613_v25, 16  ;;  %v653_v43 = vshll.u32 %v613_v25, 16  ;;  %v3662_v46 = vrot.slane %v2643_v24, 5  ;;  %v480_v16 = vld [vmem:[%s2507_s20 + $0x2c] sm:$0xf] }
  0x2e   : > { %420 = vrot.lane.b32.xlu0 %v348_v18, %s2464_s26  ;;  %v378_v33 = vsel %vm2581_vm11, %v373_v21, %v2631_v14  ;;  %v645_v40 = vrot.slane %v643_v30, 7  ;;  %v631_v48 = vshrl.u32 %v611_v27, 16  ;;  %v634_v49 = vshll.u32 %v611_v27, 16  ;;  %v621_v25 = vld [vmem:[%s2507_s20 + $0x2c] sm:$0xf] }
  0x2f   : > { %548 = vrot.lane.b32.xlu1 %v508_v19, %s2460_s22  ;;  %v514_v35 = vsel %vm2621_vm14, %v512_v26, %v3667_v23  ;;  %v509_v50 = vrot.slane %v507_v57, 4  ;;  %v530_v51 = vrot.slane %v528_v28, 4  ;;  %v531_v53 = vrot.slane %v479_v36, 5  ;;  %220 = vst.msk [vmem:[#allocation2 + $0xc] sm:$0xf] %vm216_vm2, %v204_v3 }
  0x30   : > { %v368_v55 = vsel %vm2581_vm11, %v363_v34, %v367_v62  ;;  %v633_v56 = vrot.slane %v631_v48, 6  ;;  %v636_v58 = vrot.slane %v634_v49, 7  ;;  %v660_v59 = vshrl.u32 %v614_v44, 16  ;;  %219 = vst.msk [vmem:[#allocation2 + $0x8] sm:$0xf] %vm216_vm2, %v203_v6 }
  0x31   : > { %v646_v60 = vor.u32 %v645_v40, %v642_v37  ;;  %v652_v63 = vrot.slane %v650_v41, 6  ;;  %v655_v5 = vrot.slane %v653_v43, 7  ;;  %v663_v8 = vshll.u32 %v614_v44, 16  ;;  %v2682_v37 = vld [vmem:[%s2507_s20 + $0x30] sm:$0xf] }
  0x32   : > { %546 = vrot.lane.b32.xlu0 %v505_v32, %s2460_s22  ;;  %v527_v57 = vrot.slane %v3662_v46, 4  ;;  %v637_v13 = vor.u32 %v636_v58, %v633_v56  ;;  %v670_v17 = vshrl.u32 %v615_v54, 16  ;;  %v662_v62 = vrot.slane %v660_v59, 6  ;;  %v622_v56 = vld [vmem:[%s2507_s20 + $0x30] sm:$0xf] }
  0x33   : > { %426 = vrot.lane.b32.xlu1 %v378_v33, %s2464_s26  ;;  %v665_v18 = vrot.slane %v663_v8, 7  ;;  %v673_v19 = vshll.u32 %v615_v54, 16  ;;  %v511_v20 = vsel %vm2621_vm14, %v509_v50, %v510_v11  ;;  %v532_v21 = vsel %vm2621_vm14, %v530_v51, %v531_v53  ;;  %v619_v33 = vld [vmem:[%s2507_s20 + $0x24] sm:$0xf]  ;;  %v244_v23 = vld [vmem:[%s2507_s20 + $0x1c] sm:$0xf] }
  0x34   : > { %v720_v26 = vshrl.u32 %v620_v12, 16  ;;  %v648_v29 = vrot.slane %v646_v60, 4  ;;  %v656_v30 = vor.u32 %v655_v5, %v652_v63  ;;  %v534_v27 = vrot.slane %v480_v16, 5  ;;  %v854_v16 = vld [vmem:[%s2507_s20 + $0x8] sm:$0xf] }
  0x35   : > { %v723_v32 = vshll.u32 %v620_v12, 16  ;;  %v529_v34 = vsel %vm2621_vm14, %v527_v57, %v528_v28  ;;  %v638_v36 = vrot.slane %v637_v13, 4  ;;  %v672_v40 = vrot.slane %v670_v17, 6 }
  0x36   : > { %424 = vrot.lane.b32.xlu0 %v368_v55, %s2464_s26  ;;  %v666_v11 = vor.u32 %v665_v18, %v662_v62  ;;  %v675_v41 = vrot.slane %v673_v19, 7  ;;  %v722_v43 = vrot.slane %v720_v26, 6  ;;  %v730_v44 = vshrl.u32 %v621_v25, 16 }
  0x37   : > { %552 = vrot.lane.b32.xlu1 %v514_v35, %s2460_s22  ;;  %v725_v48 = vrot.slane %v723_v32, 7  ;;  %v733_v49 = vshll.u32 %v621_v25, 16  ;;  %v710_v35 = vshrl.u32 %v619_v33, 16  ;;  %v713_v50 = vshll.u32 %v619_v33, 16  ;;  %v855_v32 = vld [vmem:[%s2507_s20 + $0xc] sm:$0xf] }
  0x38   : > { %v657_v28 = vsel %vm2560_vm10, %v648_v29, %v656_v30  ;;  %v536_v51 = vrot.slane %v534_v27, 4  ;;  %v3663_v54 = vrot.slane %v2682_v37, 5  ;;  %v533_v55 = vrot.slane %v531_v53, 4 }
  0x39   : > { %v647_v58 = vsel %vm2560_vm10, %v638_v36, %v646_v60  ;;  %v668_v59 = vrot.slane %v666_v11, 4  ;;  %v2693_v63 = vor.u32 %v675_v41, %v672_v40  ;;  %v732_v5 = vrot.slane %v730_v44, 6  ;;  %v623_v60 = vld [vmem:[%s2507_s20 + $0x34] sm:$0xf] }
  0x3a   : > { %550 = vrot.lane.b32.xlu0 %v511_v20, %s2460_s22  ;;  %v726_v8 = vor.u32 %v725_v48, %v722_v43  ;;  %v735_v12 = vrot.slane %v733_v49, 7  ;;  %v712_v57 = vrot.slane %v710_v35, 6  ;;  %v715_v13 = vrot.slane %v713_v50, 7  ;;  %v853_v48 = vld [vmem:[%s2507_s20 + $0x4] sm:$0x8] }
  0x3b   : > { %564 = vrot.lane.b32.xlu1 %v532_v21, %s2460_s22  ;;  %v538_v53 = vsel %vm2621_vm14, %v536_v51, %v3663_v54  ;;  %v740_v17 = vshrl.u32 %v622_v56, 16  ;;  %v743_v62 = vshll.u32 %v622_v56, 16  ;;  %v535_v18 = vsel %vm2621_vm14, %v533_v55, %v534_v27 }
  0x3c   : > { %v677_v19 = vsel %vm2560_vm10, %v668_v59, %v2693_v63  ;;  %v658_v20 = vrot.slane %v656_v30, 4  ;;  %v728_v21 = vrot.slane %v726_v8, 4  ;;  %v736_v25 = vor.u32 %v735_v12, %v732_v5  ;;  %v2730_v59 = vld [vmem:[%s2507_s20 + $0x14] sm:$0xf]  ;;  %v862_v12 = vld [vmem:[%s2507_s20 + $0x28] sm:$0xf] }
  0x3d   : > { %v2709_v26 = vor.u32 %v715_v13, %v712_v57  ;;  %v890_v29 = vrot.slane %v854_v16, 7  ;;  %v742_v33 = vrot.slane %v740_v17, 6  ;;  %v750_v36 = vshrl.u32 %v623_v60, 16  ;;  %v1000_v57 = vld [vmem:[%s2507_s20 + $0x8] sm:$0xf] }
  0x3e   : > { %562 = vrot.lane.b32.xlu0 %v529_v34, %s2460_s22  ;;  %v745_v34 = vrot.slane %v743_v62, 7  ;;  %v753_v40 = vshll.u32 %v623_v60, 16  ;;  %v667_v30 = vsel %vm2560_vm10, %v658_v20, %v666_v11  ;;  %v893_v43 = vrot.slane %v855_v32, 7  ;;  %v1001_v13 = vld [vmem:[%s2507_s20 + $0xc] sm:$0xf] }
  0x3f   : > { %790 = vrot.lane.b32.xlu1 %v657_v28, %s2463_s25  ;;  %v718_v27 = vrot.slane %v2709_v26, 4  ;;  %v892_v41 = vrot.slane %v890_v29, 4  ;;  %v737_v44 = vsel %vm2560_vm10, %v728_v21, %v736_v25  ;;  %v752_v35 = vrot.slane %v750_v36, 6  ;;  %v856_v28 = vld [vmem:[%s2507_s20 + $0x10] sm:$0xf] }
  0x40   : > { %v746_v49 = vor.u32 %v745_v34, %v742_v33  ;;  %v755_v50 = vrot.slane %v753_v40, 7  ;;  %v2278_v51 = vrot.slane %v853_v48, 11  ;;  %v896_v5 = vrot.slane %v856_v28, 7  ;;  %v2741_v62 = vld [vmem:[%s2507_s20 + $0x24] sm:$0xf] }
  0x41   : > { %v727_v11 = vsel %vm2560_vm10, %v718_v27, %v726_v8  ;;  %v894_v55 = vsel %vm2522_vm6, %v892_v41, %v893_v43  ;;  %v3660_v16 = vrot.slane %v2730_v59, 7  ;;  %v914_v17 = vrot.slane %v862_v12, 7  ;;  %v1002_v40 = vld [vmem:[%s2507_s20 + $0x10] sm:$0xf]  ;;  %v1003_v48 = vld [vmem:[%s2507_s20 + $0x14] sm:$0xf] }
  0x42   : > { %788 = vrot.lane.b32.xlu0 %v647_v58, %s2463_s25  ;;  %v748_v56 = vrot.slane %v746_v49, 4  ;;  %v2727_v58 = vor.u32 %v755_v50, %v752_v35  ;;  %v891_v8 = vsel %vm2522_vm6, %v2278_v51, %v890_v29  ;;  %v1024_v20 = vshrl.u32 %v1000_v57, 16  ;;  %v999_v29 = vld [vmem:[%s2507_s20 + $0x4] sm:$0x8]  ;;  %v864_v35 = vld [vmem:[%s2507_s20 + $0x30] sm:$0xf] }
  0x43   : > { %568 = vrot.lane.b32.xlu1 %v538_v53, %s2460_s22  ;;  %v738_v53 = vrot.slane %v736_v25, 4  ;;  %v1033_v21 = vshrl.u32 %v1001_v13, 16  ;;  %v3658_v25 = vrot.slane %v2741_v62, 7  ;;  %v895_v33 = vrot.slane %v893_v43, 4 }
  0x44   : > { %v757_v60 = vsel %vm2560_vm10, %v748_v56, %v2727_v58  ;;  %v916_v34 = vrot.slane %v914_v17, 4  ;;  %v1026_v27 = vrot.slane %v1024_v20, 7  ;;  %v1027_v28 = vshll.u32 %v1000_v57, 16 }
  0x45   : > { %v747_v32 = vsel %vm2560_vm10, %v738_v53, %v746_v49  ;;  %v2758_v41 = vrot.slane %v1033_v21, 7  ;;  %v913_v43 = vrot.slane %v3658_v25, 4  ;;  %v1019_v49 = vshrl.u32 %v999_v29, 16  ;;  %v1008_v53 = vld [vmem:[%s2507_s20 + $0x28] sm:$0xf] }
  0x46   : > { %566 = vrot.lane.b32.xlu0 %v535_v18, %s2460_s22  ;;  %v898_v18 = vrot.slane %v896_v5, 4  ;;  %v897_v50 = vsel %vm2522_vm6, %v895_v33, %v896_v5  ;;  %v1042_v51 = vshrl.u32 %v1002_v40, 16  ;;  %v1031_v12 = vrot.slane %v1026_v27, 4 }
  0x47   : > { %794 = vrot.lane.b32.xlu1 %v677_v19, %s2463_s25  ;;  %v863_v19 = vld [vmem:[%s2507_s20 + $0x2c] sm:$0xf]  ;;  %v915_v5 = vsel %vm2522_vm6, %v913_v43, %v914_v17  ;;  %v2279_v57 = vrot.slane %v1019_v49, 11  ;;  %v1054_v29 = vshll.u32 %v1003_v48, 16  ;;  %v1007_v17 = vld [vmem:[%s2507_s20 + $0x24] sm:$0xf] }
  0x48   : > { %v917_v36 = vrot.slane %v863_v19, 7  ;;  %v1029_v19 = vor.u32 %v1027_v28, %v1026_v27  ;;  %v1044_v20 = vrot.slane %v1042_v51, 7  ;;  %v1087_v49 = vshrl.u32 %v1007_v17, 16  ;;  %v234_v17 = vld [vmem:[#allocation2 + $0x38] sm:$0x7] }
  0x4a   : > { %792 = vrot.lane.b32.xlu0 %v667_v30, %s2463_s25  ;;  %v900_v30 = vsel %vm2522_vm6, %v898_v18, %v3660_v16  ;;  %v918_v56 = vsel %vm2522_vm6, %v916_v34, %v917_v36  ;;  %v1096_v34 = vshrl.u32 %v1008_v53, 16  ;;  %v1030_v27 = vsel %vm2546_vm9, %v2279_v57, %v1029_v19  ;;  %v209_v16 = vld [vmem:[%s2507_s20 + $0x20] sm:$0xf] }
  0x4b   : > { %806 = vrot.lane.b32.xlu1 %v737_v44, %s2463_s25  ;;  %v1036_v44 = vshll.u32 %v1001_v13, 16  ;;  %v2811_v57 = vrot.slane %v1087_v49, 7  ;;  %v1099_v19 = vshll.u32 %v1008_v53, 16  ;;  %v1222_v53 = vld [vmem:[%s2507_s20 + $0xc] sm:$0xe] }
  0x4c   : > { %v1098_v28 = vrot.slane %v1096_v34, 7  ;;  %v2280_v46 = vrot.slane %v1222_v53, 9  ;;  %225 = vst.msk [vmem:[#allocation2 + $0x20] sm:$0xf] %vm216_vm2, %v209_v16 }
  0x4d   : > { %v1038_v13 = vor.u32 %v1036_v44, %v2758_v41  ;;  %v919_v44 = vrot.slane %v917_v36, 4  ;;  %v2798_v36 = vld [vmem:[%s2507_s20 + $0x10] sm:$0xf] }
  0x4e   : > { %804 = vrot.lane.b32.xlu0 %v727_v11, %s2463_s25  ;;  %v2769_v11 = vld [vmem:[%s2507_s20 + $0x34] sm:$0xf] }
  0x4f   : > { %936 = vrot.lane.b32.xlu1 %v894_v55, %s2461_s23  ;;  %v1051_v55 = vshrl.u32 %v1003_v48, 16  ;;  %v3659_v18 = vrot.slane %v2769_v11, 7  ;;  %v1049_v48 = vrot.slane %v1044_v20, 4 }
  0x51   : > { %v2781_v21 = vrot.slane %v1051_v55, 7 }
  0x52   : > { %934 = vrot.lane.b32.xlu0 %v891_v8, %s2461_s23  ;;  %v920_v8 = vrot.slane %v864_v35, 7  ;;  %v1045_v35 = vshll.u32 %v1002_v40, 16  ;;  %v2801_v40 = vld [vmem:[%s2507_s20 + $0x30] sm:$0xf] }
  0x53   : > { %810 = vrot.lane.b32.xlu1 %v757_v60, %s2463_s25  ;;  %v1009_v60 = vld [vmem:[%s2507_s20 + $0x2c] sm:$0xf]  ;;  %v1056_v43 = vor.u32 %v1054_v29, %v2781_v21  ;;  %v1254_v29 = vrot.slane %v2798_v36, 5 }
  0x54   : > { %v922_v33 = vrot.slane %v920_v8, 4  ;;  %v1108_v55 = vshll.u32 %v1009_v60, 16 }
  0x55   : > { %v1255_v6 = vsel %vm2621_vm14, %v2280_v46, %v1254_v29 }
  0x56   : > { %808 = vrot.lane.b32.xlu0 %v747_v32, %s2463_s25  ;;  %v1039_v32 = vsel %vm2546_vm9, %v1031_v12, %v1038_v13  ;;  %v921_v12 = vsel %vm2522_vm6, %v919_v44, %v920_v8  ;;  %v1040_v13 = vrot.slane %v2758_v41, 4  ;;  %v1114_v41 = vshrl.u32 %v2801_v40, 16 }
  0x57   : > { %940 = vrot.lane.b32.xlu1 %v900_v30, %s2461_s23  ;;  %v1105_v30 = vshrl.u32 %v1009_v60, 16  ;;  %v1057_v60 = vsel %vm2546_vm9, %v1049_v48, %v1056_v43  ;;  %v1094_v44 = vrot.slane %v2811_v57, 4  ;;  %v2830_v43 = vld [vmem:[%s2507_s20 + $0x18] sm:$0xf] }
  0x59   : > { %v2795_v51 = vrot.slane %v1105_v30, 7  ;;  %v1362_v30 = vld [vmem:[%s2507_s20 + $0x10] sm:$0xf] }
  0x5a   : > { %938 = vrot.lane.b32.xlu0 %v897_v50, %s2461_s23  ;;  %v924_v50 = vsel %vm2522_vm6, %v922_v33, %v3659_v18  ;;  %v2816_v33 = vld [vmem:[%s2507_s20 + $0x14] sm:$0xf]  ;;  %v1388_v25 = vshrl.u32 %v1362_v30, 16  ;;  %v210_v18 = vld [vmem:[%s2507_s20 + $0x24] sm:$0xf]  ;;  %v1391_v4 = vshll.u32 %v1362_v30, 16 }
  0x5b   : > { %952 = vrot.lane.b32.xlu1 %v918_v56, %s2461_s23  ;;  %v1011_v56 = vld [vmem:[%s2507_s20 + $0x34] sm:$0xf]  ;;  %v1110_v8 = vor.u32 %v1108_v55, %v2795_v51  ;;  %v1257_v48 = vrot.slane %v2816_v33, 5  ;;  %v1116_v55 = vrot.slane %v1114_v41, 7  ;;  %v211_v41 = vld [vmem:[%s2507_s20 + $0x28] sm:$0xf] }
  0x5c   : > { %v1361_v30 = vld [vmem:[%s2507_s20 + $0xc] sm:$0xe]  ;;  %226 = vst.msk [vmem:[#allocation2 + $0x24] sm:$0xf] %vm216_vm2, %v210_v18  ;;  %227 = vst.msk [vmem:[#allocation2 + $0x28] sm:$0xf] %vm216_vm2, %v211_v41 }
  0x5d   : > { %v1121_v49 = vrot.slane %v1116_v55, 4  ;;  %v1379_v3 = vshrl.u32 %v1361_v30, 16  ;;  %v1112_v16 = vrot.slane %v2795_v51, 4  ;;  %v1365_v41 = vld [vmem:[%s2507_s20 + $0x1c] sm:$0xf] }
  0x5e   : > { %950 = vrot.lane.b32.xlu0 %v915_v5, %s2461_s23  ;;  %v1047_v5 = vor.u32 %v1045_v35, %v1044_v20  ;;  %v1123_v20 = vshrl.u32 %v1011_v56, 16  ;;  %v1101_v35 = vor.u32 %v1099_v19, %v1098_v28  ;;  %v201_v19 = vld [vmem:[%s2507_s20] sm:$0xf] }
  0x5f   : > { %1159 = vrot.lane.b32.xlu1 %v1039_v32, %s2462_s24  ;;  %v1103_v32 = vrot.slane %v1098_v28, 4  ;;  %217 = vst.msk [vmem:[#allocation2] sm:$0xf] %vm216_vm2, %v201_v19 }
  0x60   : > { %v1048_v34 = vsel %vm2546_vm9, %v1040_v13, %v1047_v5  ;;  %v1126_v13 = vshll.u32 %v1011_v56, 16  ;;  %v1363_v5 = vld [vmem:[%s2507_s20 + $0x14] sm:$0xf]  ;;  %v1102_v56 = vsel %vm2546_vm9, %v1094_v44, %v1101_v35  ;;  %v2870_v44 = vld [vmem:[%s2507_s20 + $0x30] sm:$0xf]  ;;  %v1390_v35 = vrot.slane %v1388_v25, 5 }
  0x61   : > { %v1111_v28 = vsel %vm2546_vm9, %v1103_v32, %v1110_v8  ;;  %v212_v8 = vld [vmem:[%s2507_s20 + $0x2c] sm:$0xf]  ;;  %v1398_v54 = vshrl.u32 %v1363_v5, 16  ;;  %v1401_v53 = vshll.u32 %v1363_v5, 16  ;;  %v1278_v19 = vrot.slane %v2870_v44, 5 }
  0x62   : > { %1157 = vrot.lane.b32.xlu0 %v1030_v27, %s2462_s24  ;;  %v1256_v27 = vrot.slane %v1254_v29, 4  ;;  %228 = vst.msk [vmem:[#allocation2 + $0x2c] sm:$0xf] %vm216_vm2, %v212_v8  ;;  %v2882_v25 = vld [vmem:[%s2507_s20 + $0x2c] sm:$0xf]  ;;  %v1381_v29 = vrot.slane %v1379_v3, 5 }
  0x63   : > { %956 = vrot.lane.b32.xlu1 %v924_v50, %s2461_s23  ;;  %v215_v50 = vld [vmem:[%s2507_s20 + $0x38] sm:$0x7]  ;;  %v3664_v36 = vrot.slane %v2882_v25, 5  ;;  %v1403_v51 = vrot.slane %v1401_v53, 6  ;;  %v2925_v3 = vld [vmem:[%s2507_s20 + $0x3c] sm:$0xf] }
  0x64   : > { %v235_v32 = vsel %vm2834_vm1, %v215_v50, %v234_v17  ;;  %v2866_v50 = vld [vmem:[%s2507_s20 + $0x1c] sm:$0xf]  ;;  %v2900_v8 = vld [vmem:[%s2507_s20 + $0x38] sm:$0xf]  ;;  %vm449_vm1 = vcmask 109624  }
  0x65   : > { %236 = vst [vmem:[#allocation2 + $0x38] sm:$0x7] %v235_v32  ;;  %v1400_v32 = vrot.slane %v1398_v54, 5  ;;  %v1259_v54 = vrot.slane %v1257_v48, 4  ;;  %v1277_v44 = vrot.slane %v3664_v36, 4 }
  0x66   : > { %954 = vrot.lane.b32.xlu0 %v921_v12, %s2461_s23  ;;  %v2841_v12 = vrot.slane %v1123_v20, 7  ;;  %v1258_v20 = vsel %vm2621_vm14, %v1256_v27, %v1257_v48  ;;  %v1382_v27 = vshll.u32 %v1361_v30, 16 }
  0x67   : > { %1163 = vrot.lane.b32.xlu1 %v1057_v60, %s2462_s24  ;;  %v202_v60 = vld [vmem:[%s2507_s20 + $0x4] sm:$0xf]  ;;  %v2922_v48 = vor.u32 %v1403_v51, %v1400_v32  ;;  %v1279_v51 = vsel %vm2621_vm14, %v1277_v44, %v1278_v19 }
  0x68   : > { %v1128_v17 = vor.u32 %v1126_v13, %v2841_v12  ;;  %218 = vst.msk [vmem:[#allocation2 + $0x4] sm:$0xf] %vm216_vm2, %v202_v60  ;;  %v2892_v13 = vld [vmem:[%s2507_s20 + $0x34] sm:$0xf] }
  0x6a   : > { %1161 = vrot.lane.b32.xlu0 %v1048_v34, %s2462_s24  ;;  %v1117_v34 = vshll.u32 %v2801_v40, 16  ;;  %v1393_v40 = vrot.slane %v1391_v4, 6  ;;  %v1364_v4 = vld [vmem:[%s2507_s20 + $0x18] sm:$0xf]  ;;  %v1129_v5 = vsel %vm2546_vm9, %v1121_v49, %v1128_v17  ;;  %v1280_v49 = vrot.slane %v1278_v19, 4 }
  0x6b   : > { %1175 = vrot.lane.b32.xlu1 %v1111_v28, %s2462_s24  ;;  %v1260_v28 = vrot.slane %v2830_v43, 5  ;;  %v3666_v43 = vrot.slane %v2866_v50, 5  ;;  %v1281_v17 = vrot.slane %v2892_v13, 5 }
  0x6c   : > { %v1119_v18 = vor.u32 %v1117_v34, %v1116_v55  ;;  %v2903_v46 = vor.u32 %v1393_v40, %v1390_v35  ;;  %v1384_v55 = vrot.slane %v1382_v27, 6  ;;  %v1411_v34 = vshll.u32 %v1364_v4, 16  ;;  %v1370_v40 = vld [vmem:[%s2507_s20 + $0x30] sm:$0xf] }
  0x6d   : > { %v1262_v60 = vrot.slane %v1260_v28, 4  ;;  %v1284_v35 = vrot.slane %v2900_v8, 5  ;;  %v1418_v27 = vshrl.u32 %v1365_v41, 16  ;;  %v1471_v32 = vshll.u32 %v1370_v40, 16  ;;  %v1369_v8 = vld [vmem:[%s2507_s20 + $0x2c] sm:$0xf] }
  0x6e   : > { %1173 = vrot.lane.b32.xlu0 %v1102_v56, %s2462_s24  ;;  %v1120_v56 = vsel %vm2546_vm9, %v1112_v16, %v1119_v18  ;;  %v1396_v33 = vrot.slane %v2903_v46, 4  ;;  %v1385_v53 = vor.u32 %v1384_v55, %v1381_v29  ;;  %v1413_v13 = vrot.slane %v1411_v34, 6 }
  0x6f   : > { %1298 = vrot.lane.b32.xlu1 %v1258_v20, %s2459_s21  ;;  %v1408_v20 = vshrl.u32 %v1364_v4, 16  ;;  %v1264_v30 = vsel %vm2621_vm14, %v1262_v60, %v3666_v43  ;;  %v1421_v4 = vshll.u32 %v1365_v41, 16  ;;  %v1468_v60 = vshrl.u32 %v1370_v40, 16 }
  0x70   : > { %v3665_v29 = vrot.slane %v2925_v3, 5  ;;  %v1405_v55 = vsel %vm2931_vm5, %v1396_v33, %v2922_v48  ;;  %v1286_v41 = vrot.slane %v1284_v35, 4  ;;  %v1473_v44 = vrot.slane %v1471_v32, 6 }
  0x71   : > { %v1410_v18 = vrot.slane %v1408_v20, 5  ;;  %v1423_v34 = vrot.slane %v1421_v4, 6  ;;  %v1470_v19 = vrot.slane %v1468_v60, 5 }
  0x72   : > { %1296 = vrot.lane.b32.xlu0 %v1255_v6, %s2459_s21  ;;  %v1261_v6 = vsel %vm2621_vm14, %v1259_v54, %v1260_v28  ;;  %v1371_v28 = vld [vmem:[%s2507_s20 + $0x34] sm:$0xf]  ;;  %v1420_v54 = vrot.slane %v1418_v27, 5  ;;  %v1288_v33 = vsel %vm2621_vm14, %v1286_v41, %v3665_v29  ;;  %v3040_v29 = vld [vmem:[%s2507_s20 + $0x2c] sm:$0xf] }
  0x73   : > { %1179 = vrot.lane.b32.xlu1 %v1129_v5, %s2462_s24  ;;  %v1282_v5 = vsel %vm2621_vm14, %v1280_v49, %v1281_v17  ;;  %v1414_v20 = vor.u32 %v1413_v13, %v1410_v18  ;;  %v1461_v49 = vshll.u32 %v1369_v8, 16  ;;  %v1478_v40 = vshrl.u32 %v1371_v28, 16 }
  0x74   : > { %v1481_v36 = vshll.u32 %v1371_v28, 16  ;;  %v1474_v60 = vor.u32 %v1473_v44, %v1470_v19 }
  0x75   : > { %v1416_v18 = vrot.slane %v1414_v20, 4  ;;  %v1463_v4 = vrot.slane %v1461_v49, 6  ;;  %v1480_v32 = vrot.slane %v1478_v40, 5  ;;  %v1372_v49 = vld [vmem:[%s2507_s20 + $0x38] sm:$0xf] }
  0x76   : > { %1177 = vrot.lane.b32.xlu0 %v1120_v56, %s2462_s24  ;;  %v1386_v56 = vrot.slane %v1385_v53, 4  ;;  %v1283_v53 = vrot.slane %v1281_v17, 4  ;;  %v1406_v17 = vrot.slane %v2922_v48, 4  ;;  %v1476_v41 = vrot.slane %v1474_v60, 4  ;;  %v242_v48 = vld [vmem:[%s2507_s20 + $0x14] sm:$0xf] }
  0x77   : > { %1302 = vrot.lane.b32.xlu1 %v1264_v30, %s2459_s21  ;;  %v1458_v30 = vshrl.u32 %v1369_v8, 16  ;;  %v1483_v8 = vrot.slane %v1481_v36, 6 }
  0x78   : > { %v1395_v27 = vsel %vm2931_vm5, %v1386_v56, %v2903_v46  ;;  %v1285_v46 = vsel %vm2621_vm14, %v1283_v53, %v1284_v35  ;;  %v1592_v56 = vld [vmem:[%s2507_s20 + $0xc] sm:$0xc]  ;;  %v1415_v35 = vsel %vm2931_vm5, %v1406_v17, %v1414_v20 }
  0x79   : > { %v1460_v13 = vrot.slane %v1458_v30, 5  ;;  %v2281_v19 = vrot.slane %v1592_v56, 10  ;;  %v243_v56 = vld [vmem:[%s2507_s20 + $0x18] sm:$0xf] }
  0x7a   : > { %1300 = vrot.lane.b32.xlu0 %v1261_v6, %s2459_s21  ;;  %v299_v6 = vshrl.u32 %v2569_v52, 16  ;;  %v1375_v52 = vld [vmem:[%s2507_s20 + $0x44] sm:$0xf] }
  0x7b   : > { %1314 = vrot.lane.b32.xlu1 %v1282_v5, %s2459_s21  ;;  %v2958_v5 = vor.u32 %v1423_v34, %v1420_v54  ;;  %v1521_v28 = vshll.u32 %v1375_v52, 16  ;;  %v2971_v54 = vor.u32 %v1483_v8, %v1480_v32  ;;  %v1593_v34 = vld [vmem:[%s2507_s20 + $0x10] sm:$0xf]  ;;  %v1488_v32 = vshrl.u32 %v1372_v49, 16 }
  0x7c   : > { %v301_v30 = vrot.slane %v299_v6, 4  ;;  %v309_v6 = vshrl.u32 %v242_v48, 16  ;;  %v1491_v8 = vshll.u32 %v1372_v49, 16 }
  0x7d   : > { %v1425_v36 = vsel %vm2931_vm5, %v1416_v18, %v2958_v5  ;;  %v1523_v40 = vrot.slane %v1521_v28, 6  ;;  %v305_v18 = vshll.u32 %v242_v48, 16  ;;  %v1485_v20 = vsel %vm2931_vm5, %v1476_v41, %v2971_v54  ;;  %v1594_v28 = vld [vmem:[%s2507_s20 + $0x14] sm:$0xf] }
  0x7e   : > { %1312 = vrot.lane.b32.xlu0 %v1279_v51, %s2459_s21  ;;  %v1518_v51 = vshrl.u32 %v1375_v52, 16  ;;  %v302_v52 = vor.u32 %v301_v30, %v2586_v15  ;;  %v206_v41 = vld [vmem:[%s2507_s20 + $0x14] sm:$0xf]  ;;  %v1490_v49 = vrot.slane %v1488_v32, 5 }
  0x7f   : > { %1529 = vrot.lane.b32.xlu1 %v1405_v55, %s2465_s27  ;;  %v2965_v55 = vor.u32 %v1463_v4, %v1460_v13  ;;  %v307_v15 = vrot.slane %v305_v18, 5  ;;  %222 = vst.msk [vmem:[#allocation2 + $0x14] sm:$0xf] %vm216_vm2, %v206_v41  ;;  %v315_v18 = vshll.u32 %v243_v56, 16  ;;  %v1486_v41 = vrot.slane %v2971_v54, 4 }
  0x80   : > { %v1520_v44 = vrot.slane %v1518_v51, 5  ;;  %v303_v30 = vrot.slane %v302_v52, 4 }
  0x81   : > { %v1466_v53 = vrot.slane %v2965_v55, 4  ;;  %v3045_v54 = vrot.slane %v315_v18, 5  ;;  %v3668_v18 = vrot.slane %v3040_v29, 6 }
  0x82   : > { %1527 = vrot.lane.b32.xlu0 %v1395_v27, %s2465_s27  ;;  %v1629_v27 = vrot.slane %v1593_v34, 6  ;;  %v2998_v51 = vor.u32 %v1523_v40, %v1520_v44  ;;  %v1373_v44 = vld [vmem:[%s2507_s20 + $0x3c] sm:$0xf] }
  0x83   : > { %1318 = vrot.lane.b32.xlu1 %v1288_v33, %s2459_s21  ;;  %v205_v33 = vld [vmem:[%s2507_s20 + $0x10] sm:$0xf]  ;;  %v1498_v52 = vshrl.u32 %v1373_v44, 16  ;;  %v1501_v32 = vshll.u32 %v1373_v44, 16  ;;  %v2438_v44 = vld [vmem:[%s3652_s1 + $0x8] sm:$0xff]  }
  0x84   : > { %221 = vst.msk [vmem:[#allocation2 + $0x10] sm:$0xf] %vm216_vm2, %v205_v33  ;;  %v1630_v48 = vsel %vm2993_vm12, %v2281_v19, %v1629_v27  ;;  %v1526_v33 = vrot.slane %v2998_v51, 4  ;;  %v1632_v19 = vrot.slane %v1594_v28, 6  ;;  %v308_v28 = vsel %vm2581_vm11, %v303_v30, %v307_v15 }
  0x86   : > { %1316 = vrot.lane.b32.xlu0 %v1285_v46, %s2459_s21  ;;  %v1475_v46 = vsel %vm2931_vm5, %v1466_v53, %v1474_v60  ;;  %v2437_v60 = vld [vmem:[%s3652_s1] sm:$0xff]   ;;  %v1631_v53 = vrot.slane %v1629_v27, 4  ;;  %v466_v27 = vld [vmem:[#allocation2 + $0x38] sm:$0x7]  ;;  %v1634_v30 = vrot.slane %v1632_v19, 4 }
  0x87   : > { %1533 = vrot.lane.b32.xlu1 %v1425_v36, %s2465_s27  ;;  %v311_v36 = vrot.slane %v309_v6, 4  ;;  %2386 = vmatprep.subr.bf16.mxu0 %v2437_v60 }
  0x88   : > { %v2983_v13 = vpop.permute.xlu1 %1324  ;;  %v2985_v4 = vpop.permute.xlu0 %574  ;;  %2387 = vmatpush3.bf16.msra.mxu0 %v2437_v60  ;;  %2410 = vmatprep.subr.bf16.mxu1 %v2437_v60 }
  0x89   : > { %v312_v6 = vor.u32 %v311_v36, %v307_v15  ;;  %2414 = vmatpush3.bf16.msra.mxu1 %v2437_v60  ;;  %v1633_v15 = vsel %vm2993_vm12, %v1631_v53, %v1632_v19  ;;  %2388 = vmatprep.subr.bf16.mxu0 %v2438_v44  ;;  %v1500_v60 = vrot.slane %v1498_v52, 5  ;;  %v379_v53 = vshrl.u32 %v2604_v45, 16  ;;  %v1601_v52 = vld [vmem:[%s2507_s20 + $0x30] sm:$0xf] }
  0x8a   : > { %1531 = vrot.lane.b32.xlu0 %v1415_v35, %s2465_s27  ;;  %v1493_v35 = vrot.slane %v1491_v8, 6  ;;  %2411 = vmatprep.subr.bf16.mxu1 %v2438_v44 }
  0x8b   : > { %1545 = vrot.lane.b32.xlu1 %v1485_v20, %s2465_s27  ;;  %v3021_v20 = vld [vmem:[%s2507_s20 + $0x18] sm:$0xf] }
  0x8c   : > { %v3006_v34 = vpop.permute.xlu1 %962  ;;  %v3034_v36 = vor.u32 %v1493_v35, %v1490_v49  ;;  %v313_v35 = vrot.slane %v312_v6, 4  ;;  %2389 = vmatpush3.bf16.msra.mxu0 %v2438_v44 }
  0x8d   : > { %2415 = vmatpush3.bf16.msra.mxu1 %v2438_v44  ;;  %v329_v44 = vshrl.u32 %v244_v23, 16 }
  0x8e   : > { %1543 = vrot.lane.b32.xlu0 %v1475_v46, %s2465_s27  ;;  %v3016_v40 = vpop.permute.xlu0 %1185  ;;  %v1495_v19 = vsel %vm2931_vm5, %v1486_v41, %v3034_v36  ;;  %v325_v46 = vshll.u32 %v244_v23, 16 }
  0x8f   : > { %1673 = vrot.lane.b32.xlu1 %v1630_v48, %s2466_s30  ;;  %v319_v48 = vshrl.u32 %v243_v56, 16  ;;  %v1635_v56 = vrot.slane %v3021_v20, 6 }
  0x90   : > { %v3023_v8 = vpop.permute.xlu1 %816 }
  0x91   : > { %v321_v20 = vrot.slane %v319_v48, 4  ;;  %v1636_v45 = vsel %vm2993_vm12, %v1634_v30, %v1635_v56  ;;  %v3075_v48 = vld [vmem:[%s2507_s20 + $0x1c] sm:$0xf] }
  0x92   : > { %1555 = vrot.lane.b32.xlu0 %v1526_v33, %s2465_s27  ;;  %v433_v43 = vpop.permute.xlu0 %432  ;;  %v1503_v33 = vrot.slane %v1501_v32, 6  ;;  %v207_v32 = vld [vmem:[%s2507_s20 + $0x18] sm:$0xf] }
  0x93   : > { %v467_v49 = vsel %vm3027_vm15, %v433_v43, %v466_v27  ;;  %412 = vrot.lane.b32.xlu1 %v308_v28, %s2464_s26  ;;  %v2440_v43 = vld [vmem:[%s3652_s1 + $0x10] sm:$0xff]   ;;  %223 = vst.msk [vmem:[#allocation2 + $0x18] sm:$0xf] %vm216_vm2, %v207_v32  ;;  %v318_v27 = vsel %vm2581_vm11, %v313_v35, %v3045_v54  ;;  %v1496_v28 = vrot.slane %v3034_v36, 4  ;;  %v381_v32 = vrot.slane %v379_v53, 4  ;;  %vm3122_vm15 = vmand %vm848_vm8, %vm3673_vm0 }
  0x94   : > { %468 = vst [vmem:[#allocation2 + $0x38] sm:$0x7] %v467_v49  ;;  %2390 = vmatprep.subr.bf16.mxu0 %v2440_v43  ;;  %v3072_v41 = vor.u32 %v1503_v33, %v1500_v60  ;;  %v1652_v49 = vrot.slane %v3668_v18, 4  ;;  %2412 = vmatprep.subr.bf16.mxu1 %v2440_v43  ;;  %v213_v35 = vld [vmem:[%s2507_s20 + $0x30] sm:$0xf]  ;;  %v327_v33 = vrot.slane %v325_v46, 5 }
  0x95   : > { %v407_v6 = vpop.permute.xlu1 %406  ;;  %2391 = vmatpush3.bf16.msra.mxu0 %v2440_v43  ;;  %2416 = vmatpush3.bf16.msra.mxu1 %v2440_v43  ;;  %229 = vst.msk [vmem:[#allocation2 + $0x30] sm:$0xf] %vm216_vm2, %v213_v35  ;;  %v1602_v35 = vld [vmem:[%s2507_s20 + $0x34] sm:$0xf]  ;;  %v382_v60 = vor.u32 %v381_v32, %v2631_v14 }
  0x96   : > { %1675 = vrot.lane.b32.xlu0 %v1633_v15, %s2466_s30  ;;  %451 = vst.msk [vmem:[#allocation2 + $0x4] sm:$0xf] %vm449_vm1, %v407_v6  ;;  %v250_v15 = vld [vmem:[%s2507_s20 + $0x34] sm:$0xf]  ;;  %v1653_v6 = vrot.slane %v1601_v52, 6  ;;  %v1505_v52 = vsel %vm2931_vm5, %v1496_v28, %v3072_v41 }
  0x97   : > { %1547 = vrot.lane.b32.xlu1 %v1495_v19, %s2465_s27  ;;  %v322_v19 = vor.u32 %v321_v20, %v3045_v54  ;;  %v1637_v54 = vrot.slane %v1635_v56, 4  ;;  %v385_v53 = vshll.u32 %v250_v15, 16  ;;  %v389_v43 = vshrl.u32 %v250_v15, 16  ;;  %v214_v32 = vld [vmem:[%s2507_s20 + $0x34] sm:$0xf] }
  0x98   : > { %v405_v30 = vpop.permute.xlu0 %404  ;;  %v1654_v46 = vsel %vm2993_vm12, %v1652_v49, %v1653_v6  ;;  %v1655_v14 = vrot.slane %v1653_v6, 4  ;;  %230 = vst.msk [vmem:[#allocation2 + $0x34] sm:$0xf] %vm216_vm2, %v214_v32 }
  0x99   : > { %450 = vst.msk [vmem:[#allocation2] sm:$0xf] %vm449_vm1, %v405_v30  ;;  %v411_v23 = vpop.permute.xlu1 %410  ;;  %v331_v30 = vrot.slane %v329_v44, 4  ;;  %v323_v18 = vrot.slane %v322_v19, 4  ;;  %v1656_v44 = vrot.slane %v1602_v35, 6  ;;  %v387_v15 = vrot.slane %v385_v53, 5 }
  0x9a   : > { %414 = vrot.lane.b32.xlu0 %v318_v27, %s2464_s26  ;;  %453 = vst.msk [vmem:[#allocation2 + $0xc] sm:$0xf] %vm449_vm1, %v411_v23  ;;  %v208_v27 = vld [vmem:[%s2507_s20 + $0x1c] sm:$0xf]  ;;  %v391_v19 = vrot.slane %v389_v43, 4 }
  0x9b   : > { %v608_v20 = vld [vmem:[#allocation2 + $0x38] sm:$0x7]  ;;  %1677 = vrot.lane.b32.xlu1 %v1636_v45, %s2466_s30  ;;  %224 = vst.msk [vmem:[#allocation2 + $0x1c] sm:$0xf] %vm216_vm2, %v208_v27  ;;  %v332_v49 = vor.u32 %v331_v30, %v327_v33  ;;  %v474_v27 = vld [vmem:[%s2507_s20 + $0x14] sm:$0xf] }
  0x9c   : > { %v609_v56 = vsel %vm3083_vm7, %v2985_v4, %v608_v20  ;;  %v409_v23 = vpop.permute.xlu0 %408  ;;  %v3694_v4 = vrot.slane %v3075_v48, 6  ;;  %v328_v20 = vsel %vm2581_vm11, %v323_v18, %v327_v33  ;;  %v1657_v18 = vsel %vm2993_vm12, %v1655_v14, %v1656_v44  ;;  %v1603_v53 = vld [vmem:[%s2507_s20 + $0x38] sm:$0xf] }
  0x9d   : > { %610 = vst [vmem:[#allocation2 + $0x38] sm:$0x7] %v609_v56  ;;  %452 = vst.msk [vmem:[#allocation2 + $0x8] sm:$0xf] %vm449_vm1, %v409_v23  ;;  %v423_v45 = vpop.permute.xlu1 %422  ;;  %v392_v33 = vor.u32 %v391_v19, %v387_v15  ;;  %v3697_v23 = vrot.slane %v2627_v9, 5  ;;  %v516_v35 = vrot.slane %v474_v27, 5 }
  0x9e   : > { %1549 = vrot.lane.b32.xlu0 %v1505_v52, %s2465_s27  ;;  %459 = vst.msk [vmem:[#allocation2 + $0x24] sm:$0xf] %vm449_vm1, %v423_v45  ;;  %v1639_v28 = vsel %vm2993_vm12, %v1637_v54, %v3694_v4  ;;  %v383_v52 = vrot.slane %v382_v60, 4  ;;  %v333_v60 = vrot.slane %v332_v49, 4  ;;  %v1659_v14 = vrot.slane %v1603_v53, 6 }
  0x9f   : > { %1689 = vrot.lane.b32.xlu1 %v1654_v46, %s2466_s30  ;;  %v515_v46 = vrot.slane %v3697_v23, 4  ;;  %v3148_v49 = vld [vmem:[%s2507_s20 + $0x1c] sm:$0xf]  ;;  %vm994_vm2 = vcmask 280800   ;;  %vm1848_vm7 = vcmask 1047552  }
  0xa0   : > { %v421_v36 = vpop.permute.xlu0 %420  ;;  %v388_v56 = vsel %vm2581_vm11, %v383_v52, %v387_v15  ;;  %v338_v9 = vsel %vm2581_vm11, %v333_v60, %v2607_v47  ;;  %v393_v15 = vrot.slane %v392_v33, 4  ;;  %v518_v47 = vrot.slane %v516_v35, 4  ;;  %v617_v52 = vld [vmem:[%s2507_s20 + $0x1c] sm:$0xf]  ;;  %vm3168_vm8 = vmand %vm994_vm2, %vm3673_vm0 }
  0xa1   : > { %458 = vst.msk [vmem:[#allocation2 + $0x20] sm:$0xf] %vm449_vm1, %v421_v36  ;;  %v549_v54 = vpop.permute.xlu1 %548  ;;  %v517_v32 = vsel %vm2621_vm14, %v515_v46, %v516_v35  ;;  %v616_v36 = vld [vmem:[%s2507_s20 + $0x18] sm:$0xf]  ;;  %v522_v6 = vrot.slane %v3148_v49, 5  ;;  %v2467_v60 = vmov 65535  }
  0xa2   : > { %1679 = vrot.lane.b32.xlu0 %v1639_v28, %s2466_s30  ;;  %593 = vst.msk [vmem:[#allocation2 + $0x4] sm:$0xf] %vm591_vm13, %v549_v54  ;;  %v1658_v28 = vrot.slane %v1656_v44, 4  ;;  %v2441_v44 = vld [vmem:[%s3652_s1 + $0x18] sm:$0xff]   ;;  %v1849_v33 = vsel %vm1847_vm3, 4294967295, %v2467_v60  ;;  %v683_v23 = vshll.u32 %v616_v36, 16 }
  0xa3   : > { %416 = vrot.lane.b32.xlu1 %v328_v20, %s2464_s26  ;;  %v1850_v46 = vsel %vm1848_vm7, %v1849_v33, 0  ;;  %vm1217_vm2 = vcmask 338200   ;;  %vm1356_vm7 = vcmask 395600  }
  0xa4   : > { %v850_v43 = vld [vmem:[#allocation2 + $0x38] sm:$0x7]  ;;  %v547_v30 = vpop.permute.xlu0 %546  ;;  %v1660_v54 = vsel %vm2993_vm12, %v1658_v28, %v1659_v14  ;;  %v690_v28 = vshrl.u32 %v617_v52, 16  ;;  %vm3208_vm3 = vmand %vm1217_vm2, %vm3673_vm0  ;;  %vm979_vm2 = vcmask 281824  }
  0xa5   : > { %v851_v45 = vsel %vm3122_vm15, %v3023_v8, %v850_v43  ;;  %592 = vst.msk [vmem:[#allocation2] sm:$0xf] %vm591_vm13, %v547_v30  ;;  %v427_v4 = vpop.permute.xlu1 %426  ;;  %v475_v8 = vld [vmem:[%s2507_s20 + $0x18] sm:$0xf]  ;;  %v398_v43 = vsel %vm2581_vm11, %v393_v15, %v2554_v39  ;;  %v3177_v30 = vld [vmem:[%s2507_s20 + $0x34] sm:$0xf] }
  0xa6   : > { %852 = vst [vmem:[#allocation2 + $0x38] sm:$0x7] %v851_v45  ;;  %1691 = vrot.lane.b32.xlu0 %v1657_v18, %s2466_s30  ;;  %461 = vst.msk [vmem:[#allocation2 + $0x2c] sm:$0xf] %vm449_vm1, %v427_v4  ;;  %v519_v27 = vrot.slane %v475_v8, 5  ;;  %v1852_v8 = vand.u32 %v2441_v44, %v1850_v46  ;;  %vm833_vm15 = vcmask 224424  }
  0xa7   : > { %428 = vrot.lane.b32.xlu1 %v388_v56, %s2464_s26  ;;  %v3164_v18 = vld [vmem:[%s2507_s20 + $0x3c] sm:$0xf]  ;;  %v680_v56 = vshrl.u32 %v616_v36, 16  ;;  %v618_v4 = vld [vmem:[%s2507_s20 + $0x20] sm:$0xf]  ;;  %v3700_v44 = vrot.slane %v2682_v37, 5 }
  0xa8   : > { %v425_v19 = vpop.permute.xlu0 %424  ;;  %v521_v45 = vrot.slane %v519_v27, 4  ;;  %v520_v15 = vsel %vm2621_vm14, %v518_v47, %v519_v27  ;;  %v1662_v36 = vrot.slane %v3164_v18, 6  ;;  %2392 = vmatprep.subr.bf16.mxu0 %v1852_v8  ;;  %v700_v60 = vshrl.u32 %v618_v4, 16  ;;  %2413 = vmatprep.subr.bf16.mxu1 %v1852_v8  ;;  %v624_v46 = vld [vmem:[%s2507_s20 + $0x38] sm:$0xf] }
  0xa9   : > { %460 = vst.msk [vmem:[#allocation2 + $0x28] sm:$0xf] %vm449_vm1, %v425_v19  ;;  %v553_v20 = vpop.permute.xlu1 %552  ;;  %2393 = vmatpush3.bf16.msra.mxu0 %v1852_v8  ;;  %v692_v27 = vrot.slane %v690_v28, 6  ;;  %2417 = vmatpush3.bf16.msra.mxu1 %v1852_v8  ;;  %v763_v8 = vshll.u32 %v624_v46, 16 }
  0xaa   : > { %418 = vrot.lane.b32.xlu0 %v338_v9, %s2464_s26  ;;  %595 = vst.msk [vmem:[#allocation2 + $0xc] sm:$0xf] %vm591_vm13, %v553_v20  ;;  %v693_v9 = vshll.u32 %v617_v52, 16  ;;  %v539_v20 = vrot.slane %v3700_v44, 4  ;;  %v685_v52 = vrot.slane %v683_v23, 7  ;;  %v523_v47 = vsel %vm2621_vm14, %v521_v45, %v522_v6 }
  0xab   : > { %554 = vrot.lane.b32.xlu1 %v517_v32, %s2460_s22  ;;  %v1661_v32 = vrot.slane %v1659_v14, 4  ;;  %v540_v14 = vrot.slane %v3177_v30, 5  ;;  %v678_v30 = vrot.slane %v2693_v63, 4  ;;  %v702_v45 = vrot.slane %v700_v60, 6 }
  0xac   : > { %v551_v35 = vpop.permute.xlu0 %550  ;;  %v695_v53 = vrot.slane %v693_v9, 7  ;;  %v760_v9 = vshrl.u32 %v624_v46, 16 }
  0xad   : > { %v996_v49 = vld [vmem:[#allocation2 + $0x38] sm:$0x7]  ;;  %594 = vst.msk [vmem:[#allocation2 + $0x8] sm:$0xf] %vm591_vm13, %v551_v35  ;;  %v565_v19 = vpop.permute.xlu1 %564  ;;  %v541_v23 = vsel %vm2621_vm14, %v539_v20, %v540_v14  ;;  %v542_v20 = vrot.slane %v540_v14, 4 }
  0xae   : > { %v997_v39 = vsel %vm3168_vm8, %v3006_v34, %v996_v49  ;;  %430 = vrot.lane.b32.xlu0 %v398_v43, %s2464_s26  ;;  %601 = vst.msk [vmem:[#allocation2 + $0x24] sm:$0xf] %vm591_vm13, %v565_v19  ;;  %v682_v34 = vrot.slane %v680_v56, 6  ;;  %v703_v43 = vshll.u32 %v618_v4, 16  ;;  %v1663_v56 = vsel %vm2993_vm12, %v1661_v32, %v1662_v36  ;;  %vm3240_vm8 = vmand %vm1356_vm7, %vm3673_vm0 }
  0xaf   : > { %998 = vst [vmem:[#allocation2 + $0x38] sm:$0x7] %v997_v39  ;;  %1693 = vrot.lane.b32.xlu1 %v1660_v54, %s2466_s30  ;;  %v524_v54 = vrot.slane %v522_v6, 4  ;;  %v696_v28 = vor.u32 %v695_v53, %v692_v27  ;;  %v3703_v39 = vrot.slane %v2643_v24, 5  ;;  %v3704_v24 = vrot.slane %v2513_v1, 5 }
  0xb0   : > { %v563_v33 = vpop.permute.xlu0 %562  ;;  %v686_v35 = vor.u32 %v685_v52, %v682_v34  ;;  %v705_v63 = vrot.slane %v703_v43, 7  ;;  %v1012_v1 = vld [vmem:[%s2507_s20 + $0x38] sm:$0xf]  ;;  %vm3670_vm7 = vcmask 396624  }
  0xb1   : > { %600 = vst.msk [vmem:[#allocation2 + $0x20] sm:$0xf] %vm591_vm13, %v563_v33  ;;  %v791_v37 = vpop.permute.xlu1 %790  ;;  %v698_v52 = vrot.slane %v696_v28, 4  ;;  %v762_v33 = vrot.slane %v760_v9, 6  ;;  %v544_v14 = vsel %vm2621_vm14, %v542_v20, %v3704_v24 }
  0xb2   : > { %556 = vrot.lane.b32.xlu0 %v520_v15, %s2460_s22  ;;  %835 = vst.msk [vmem:[#allocation2 + $0x4] sm:$0xf] %vm833_vm15, %v791_v37  ;;  %v526_v15 = vsel %vm2621_vm14, %v524_v54, %v3703_v39  ;;  %v687_v44 = vsel %vm2560_vm10, %v678_v30, %v686_v35  ;;  %v706_v60 = vor.u32 %v705_v63, %v702_v45  ;;  %v688_v27 = vrot.slane %v686_v35, 4  ;;  %v859_v54 = vld [vmem:[%s2507_s20 + $0x1c] sm:$0xf] }
  0xb3   : > { %558 = vrot.lane.b32.xlu1 %v523_v47, %s2460_s22  ;;  %v765_v47 = vrot.slane %v763_v8, 7  ;;  %v758_v37 = vrot.slane %v2727_v58, 4  ;;  %v905_v35 = vrot.slane %v859_v54, 7  ;;  %v3707_v63 = vrot.slane %v2730_v59, 7 }
  0xb4   : > { %v789_v6 = vpop.permute.xlu0 %788  ;;  %v707_v43 = vsel %vm2560_vm10, %v698_v52, %v706_v60  ;;  %v697_v58 = vsel %vm2560_vm10, %v688_v27, %v696_v28 }
  0xb5   : > { %834 = vst.msk [vmem:[#allocation2] sm:$0xf] %vm833_vm15, %v789_v6  ;;  %v569_v49 = vpop.permute.xlu1 %568  ;;  %v766_v46 = vor.u32 %v765_v47, %v762_v33  ;;  %v901_v9 = vrot.slane %v3707_v63, 4  ;;  %v1005_v33 = vld [vmem:[%s2507_s20 + $0x1c] sm:$0xf] }
  0xb6   : > { %v1219_v19 = vld [vmem:[#allocation2 + $0x38] sm:$0x7]  ;;  %1695 = vrot.lane.b32.xlu0 %v1663_v56, %s2466_s30  ;;  %603 = vst.msk [vmem:[#allocation2 + $0x2c] sm:$0xf] %vm591_vm13, %v569_v49  ;;  %v860_v49 = vld [vmem:[%s2507_s20 + $0x20] sm:$0xf] }
  0xb7   : > { %v1220_v32 = vsel %vm3208_vm3, %v3016_v40, %v1219_v19  ;;  %570 = vrot.lane.b32.xlu1 %v541_v23, %s2460_s22  ;;  %v858_v56 = vld [vmem:[%s2507_s20 + $0x18] sm:$0xf]  ;;  %v708_v23 = vrot.slane %v706_v60, 4  ;;  %v767_v6 = vsel %vm2560_vm10, %v758_v37, %v766_v46  ;;  %v768_v39 = vrot.slane %v766_v46, 4  ;;  %v1006_v47 = vld [vmem:[%s2507_s20 + $0x20] sm:$0xf] }
  0xb8   : > { %1221 = vst [vmem:[#allocation2 + $0x38] sm:$0x7] %v1220_v32  ;;  %v567_v34 = vpop.permute.xlu0 %566  ;;  %v902_v8 = vrot.slane %v858_v56, 7  ;;  %v1004_v32 = vld [vmem:[%s2507_s20 + $0x18] sm:$0xf]  ;;  %v1069_v54 = vshrl.u32 %v1005_v33, 16 }
  0xb9   : > { %602 = vst.msk [vmem:[#allocation2 + $0x28] sm:$0xf] %vm591_vm13, %v567_v34  ;;  %v795_v40 = vpop.permute.xlu1 %794  ;;  %v717_v59 = vsel %vm2560_vm10, %v708_v23, %v2709_v26  ;;  %v866_v34 = vld [vmem:[%s2507_s20 + $0x38] sm:$0xf]  ;;  %v1060_v52 = vshrl.u32 %v1004_v32, 16  ;;  %v1063_v46 = vshll.u32 %v1004_v32, 16 }
  0xba   : > { %560 = vrot.lane.b32.xlu0 %v526_v15, %s2460_s22  ;;  %837 = vst.msk [vmem:[#allocation2 + $0xc] sm:$0xf] %vm833_vm15, %v795_v40  ;;  %v907_v15 = vrot.slane %v905_v35, 4  ;;  %v903_v20 = vsel %vm2522_vm6, %v901_v9, %v902_v8  ;;  %v904_v26 = vrot.slane %v902_v8, 4  ;;  %v777_v40 = vsel %vm2560_vm10, %v768_v39, %v2552_v38 }
  0xbb   : > { %796 = vrot.lane.b32.xlu1 %v687_v44, %s2463_s25  ;;  %v1062_v37 = vrot.slane %v1060_v52, 7  ;;  %v1058_v23 = vrot.slane %v2781_v21, 4  ;;  %v1071_v63 = vrot.slane %v1069_v54, 7  ;;  %v1132_v8 = vshrl.u32 %v1012_v1, 16 }
  0xbc   : > { %v793_v53 = vpop.permute.xlu0 %792  ;;  %vm3671_vm3 = vcmask 339224   ;;  %v1135_v32 = vshll.u32 %v1012_v1, 16  ;;  %v3710_v52 = vrot.slane %v2516_v2, 7  ;;  %v3319_v2 = vld [vmem:[%s2507_s20 + $0x24] sm:$0xf] }
  0xbd   : > { %836 = vst.msk [vmem:[#allocation2 + $0x8] sm:$0xf] %vm833_vm15, %v793_v53  ;;  %v807_v30 = vpop.permute.xlu1 %806  ;;  %v926_v53 = vrot.slane %v866_v34, 7 }
  0xbe   : > { %572 = vrot.lane.b32.xlu0 %v544_v14, %s2460_s22  ;;  %843 = vst.msk [vmem:[#allocation2 + $0x24] sm:$0xf] %vm833_vm15, %v807_v30  ;;  %v3708_v14 = vrot.slane %v2769_v11, 7  ;;  %v1078_v30 = vshrl.u32 %v1006_v47, 16  ;;  %v906_v11 = vsel %vm2522_vm6, %v904_v26, %v905_v35  ;;  %v3709_v35 = vrot.slane %v2741_v62, 7 }
  0xbf   : > { %800 = vrot.lane.b32.xlu1 %v707_v43, %s2463_s25  ;;  %v1358_v45 = vld [vmem:[#allocation2 + $0x38] sm:$0x7]  ;;  %v928_v21 = vrot.slane %v926_v53, 4 }
  0xc0   : > { %v805_v4 = vpop.permute.xlu0 %804  ;;  %v1359_v19 = vsel %vm3240_vm8, %v2983_v13, %v1358_v45  ;;  %v908_v13 = vrot.slane %v860_v49, 7  ;;  %v925_v27 = vrot.slane %v3708_v14, 4  ;;  %v1081_v45 = vshll.u32 %v1006_v47, 16 }
  0xc1   : > { %842 = vst.msk [vmem:[#allocation2 + $0x20] sm:$0xf] %vm833_vm15, %v805_v4  ;;  %v937_v28 = vpop.permute.xlu1 %936  ;;  %1360 = vst [vmem:[#allocation2 + $0x38] sm:$0x7] %v1359_v19  ;;  %v1080_v9 = vrot.slane %v1078_v30, 7  ;;  %vm1572_vm8 = vcmask 454024  }
  0xc2   : > { %798 = vrot.lane.b32.xlu0 %v697_v58, %s2463_s25  ;;  %981 = vst.msk [vmem:[#allocation2 + $0x4] sm:$0xf] %vm979_vm2, %v937_v28  ;;  %v909_v24 = vsel %vm2522_vm6, %v907_v15, %v908_v13  ;;  %v910_v38 = vrot.slane %v908_v13, 4  ;;  %v927_v58 = vsel %vm2522_vm6, %v925_v27, %v926_v53  ;;  %v1072_v28 = vshll.u32 %v1005_v33, 16  ;;  %v1227_v27 = vld [vmem:[%s2507_s20 + $0x20] sm:$0xf] }
  0xc3   : > { %812 = vrot.lane.b32.xlu1 %v767_v6, %s2463_s25  ;;  %v1065_v6 = vor.u32 %v1063_v46, %v1062_v37  ;;  %v1076_v15 = vrot.slane %v1071_v63, 4  ;;  %v1083_v13 = vor.u32 %v1081_v45, %v1080_v9  ;;  %v1067_v33 = vrot.slane %v1062_v37, 4  ;;  %v1229_v45 = vld [vmem:[%s2507_s20 + $0x28] sm:$0xf] }
  0xc4   : > { %v935_v44 = vpop.permute.xlu0 %934  ;;  %v912_v19 = vsel %vm2522_vm6, %v910_v38, %v3709_v35  ;;  %v1074_v47 = vor.u32 %v1072_v28, %v1071_v63  ;;  %v3711_v46 = vrot.slane %v2866_v50, 5  ;;  %v1266_v30 = vrot.slane %v1227_v27, 5 }
  0xc5   : > { %980 = vst.msk [vmem:[#allocation2] sm:$0xf] %vm979_vm2, %v935_v44  ;;  %v811_v60 = vpop.permute.xlu1 %810  ;;  %v1066_v39 = vsel %vm2546_vm9, %v1058_v23, %v1065_v6  ;;  %v3301_v44 = vrot.slane %v1132_v8, 7  ;;  %v1366_v23 = vld [vmem:[%s2507_s20 + $0x20] sm:$0xf]  ;;  %v1272_v28 = vrot.slane %v1229_v45, 5 }
  0xc6   : > { %802 = vrot.lane.b32.xlu0 %v717_v59, %s2463_s25  ;;  %845 = vst.msk [vmem:[#allocation2 + $0x2c] sm:$0xf] %vm833_vm15, %v811_v60  ;;  %v930_v60 = vsel %vm2522_vm6, %v928_v21, %v3710_v52  ;;  %v1265_v54 = vrot.slane %v3711_v46, 4  ;;  %v1235_v8 = vld [vmem:[%s2507_s20 + $0x40] sm:$0xf]  ;;  %v1431_v35 = vshll.u32 %v1366_v23, 16 }
  0xc7   : > { %942 = vrot.lane.b32.xlu1 %v903_v20, %s2461_s23  ;;  %v2449_v20 = vld [vmem:[%s2507_s20 + $0x24] sm:$0xf]  ;;  %v1137_v14 = vor.u32 %v1135_v32, %v3301_v44  ;;  %v1139_v6 = vrot.slane %v3301_v44, 4  ;;  %v1368_v32 = vld [vmem:[%s2507_s20 + $0x28] sm:$0xf]  ;;  %v1274_v27 = vrot.slane %v1272_v28, 4 }
  0xc8   : > { %v809_v43 = vpop.permute.xlu0 %808  ;;  %v1090_v34 = vshll.u32 %v2449_v20, 16  ;;  %v1267_v63 = vsel %vm2621_vm14, %v1265_v54, %v1266_v30  ;;  %v1433_v52 = vrot.slane %v1431_v35, 6 }
  0xc9   : > { %844 = vst.msk [vmem:[#allocation2 + $0x28] sm:$0xf] %vm833_vm15, %v809_v43  ;;  %v941_v56 = vpop.permute.xlu1 %940  ;;  %v1085_v43 = vrot.slane %v1080_v9, 4 }
  0xca   : > { %814 = vrot.lane.b32.xlu0 %v777_v40, %s2463_s25  ;;  %983 = vst.msk [vmem:[#allocation2 + $0xc] sm:$0xf] %vm979_vm2, %v941_v56  ;;  %v1084_v40 = vsel %vm2546_vm9, %v1076_v15, %v1083_v13  ;;  %v1092_v37 = vor.u32 %v1090_v34, %v2811_v57  ;;  %v2450_v56 = vld [vmem:[%s2507_s20 + $0x3c] sm:$0xf]  ;;  %v1268_v13 = vrot.slane %v1266_v30, 4 }
  0xcb   : > { %946 = vrot.lane.b32.xlu1 %v909_v24, %s2461_s23  ;;  %v1130_v24 = vrot.slane %v2841_v12, 4  ;;  %v1075_v12 = vsel %vm2546_vm9, %v1067_v33, %v1074_v47  ;;  %v1144_v1 = vshll.u32 %v2450_v56, 16 }
  0xcc   : > { %v939_v4 = vpop.permute.xlu0 %938  ;;  %v1093_v50 = vsel %vm2546_vm9, %v1085_v43, %v1092_v37 }
  0xcd   : > { %982 = vst.msk [vmem:[#allocation2 + $0x8] sm:$0xf] %vm979_vm2, %v939_v4  ;;  %v953_v49 = vpop.permute.xlu1 %952  ;;  %v1367_v4 = vld [vmem:[%s2507_s20 + $0x24] sm:$0xf]  ;;  %v1146_v9 = vor.u32 %v1144_v1, %v2540_v22  ;;  %v3712_v22 = vrot.slane %v2925_v3, 5 }
  0xce   : > { %944 = vrot.lane.b32.xlu0 %v906_v11, %s2461_s23  ;;  %989 = vst.msk [vmem:[#allocation2 + $0x24] sm:$0xf] %vm979_vm2, %v953_v49  ;;  %v1138_v11 = vsel %vm2546_vm9, %v1130_v24, %v1137_v14  ;;  %v1428_v49 = vshrl.u32 %v1366_v23, 16  ;;  %v1451_v24 = vshll.u32 %v1368_v32, 16  ;;  %v1374_v14 = vld [vmem:[%s2507_s20 + $0x40] sm:$0xf] }
  0xcf   : > { %958 = vrot.lane.b32.xlu1 %v927_v58, %s2461_s23  ;;  %v1269_v58 = vrot.slane %v3319_v2, 5  ;;  %v1289_v44 = vrot.slane %v3712_v22, 4  ;;  %v1147_v20 = vsel %vm2546_vm9, %v1139_v6, %v1146_v9  ;;  %v1508_v56 = vshrl.u32 %v1374_v14, 16 }
  0xd0   : > { %v951_v59 = vpop.permute.xlu0 %950  ;;  %v1430_v34 = vrot.slane %v1428_v49, 5  ;;  %v1453_v30 = vrot.slane %v1451_v24, 6  ;;  %v1511_v1 = vshll.u32 %v1374_v14, 16  ;;  %v1605_v24 = vld [vmem:[%s2507_s20 + $0x40] sm:$0xf] }
  0xd1   : > { %988 = vst.msk [vmem:[#allocation2 + $0x20] sm:$0xf] %vm979_vm2, %v951_v59  ;;  %v1160_v62 = vpop.permute.xlu1 %1159  ;;  %v1271_v21 = vrot.slane %v1269_v58, 4  ;;  %v1438_v59 = vshrl.u32 %v1367_v4, 16  ;;  %v1270_v2 = vsel %vm2621_vm14, %v1268_v13, %v1269_v58  ;;  %v3715_v13 = vrot.slane %v3075_v48, 6 }
  0xd2   : > { %948 = vrot.lane.b32.xlu0 %v912_v19, %s2461_s23  ;;  %1204 = vst.msk [vmem:[#allocation2 + $0x4] sm:$0xf] %vm3671_vm3, %v1160_v62  ;;  %v1290_v62 = vrot.slane %v1235_v8, 5  ;;  %v1434_v37 = vor.u32 %v1433_v52, %v1430_v34  ;;  %v1513_v6 = vrot.slane %v1511_v1, 6  ;;  %v1599_v34 = vld [vmem:[%s2507_s20 + $0x28] sm:$0xf] }
  0xd3   : > { %1165 = vrot.lane.b32.xlu1 %v1066_v39, %s2462_s24  ;;  %v1441_v39 = vshll.u32 %v1367_v4, 16  ;;  %v1273_v47 = vsel %vm2621_vm14, %v1271_v21, %v1272_v28  ;;  %v1640_v22 = vrot.slane %v3715_v13, 4 }
  0xd4   : > { %v1158_v26 = vpop.permute.xlu0 %1157  ;;  %v1291_v43 = vsel %vm2621_vm14, %v1289_v44, %v1290_v62  ;;  %v1292_v23 = vrot.slane %v1290_v62, 4  ;;  %v1436_v8 = vrot.slane %v1434_v37, 4 }
  0xd5   : > { %1203 = vst.msk [vmem:[#allocation2] sm:$0xf] %vm3671_vm3, %v1158_v26  ;;  %v957_v53 = vpop.permute.xlu1 %956  ;;  %v1440_v26 = vrot.slane %v1438_v59, 5  ;;  %v1598_v59 = vld [vmem:[%s2507_s20 + $0x24] sm:$0xf] }
  0xd6   : > { %960 = vrot.lane.b32.xlu0 %v930_v60, %s2461_s23  ;;  %991 = vst.msk [vmem:[#allocation2 + $0x2c] sm:$0xf] %vm979_vm2, %v957_v53  ;;  %v1448_v60 = vshrl.u32 %v1368_v32, 16  ;;  %v1426_v53 = vrot.slane %v2958_v5, 4  ;;  %v3713_v5 = vrot.slane %v2882_v25, 5  ;;  %v3714_v25 = vrot.slane %v2510_v0, 5 }
  0xd7   : > { %1169 = vrot.lane.b32.xlu1 %v1084_v40, %s2462_s24  ;;  %v1443_v40 = vrot.slane %v1441_v39, 6  ;;  %v1597_v32 = vld [vmem:[%s2507_s20 + $0x20] sm:$0xf]  ;;  %v1644_v62 = vrot.slane %v1598_v59, 6 }
  0xd8   : > { %v955_v38 = vpop.permute.xlu0 %954  ;;  %v1435_v58 = vsel %vm2931_vm5, %v1426_v53, %v1434_v37  ;;  %v1294_v9 = vsel %vm2621_vm14, %v1292_v23, %v3714_v25  ;;  %v1641_v44 = vrot.slane %v1597_v32, 6 }
  0xd9   : > { %990 = vst.msk [vmem:[#allocation2 + $0x28] sm:$0xf] %vm979_vm2, %v955_v38  ;;  %v1164_v57 = vpop.permute.xlu1 %1163  ;;  %v1444_v54 = vor.u32 %v1443_v40, %v1440_v26  ;;  %v1647_v26 = vrot.slane %v1599_v34, 6 }
  0xda   : > { %1167 = vrot.lane.b32.xlu0 %v1075_v12, %s2462_s24  ;;  %1206 = vst.msk [vmem:[#allocation2 + $0xc] sm:$0xf] %vm3671_vm3, %v1164_v57  ;;  %v1450_v12 = vrot.slane %v1448_v60, 5  ;;  %v1643_v14 = vrot.slane %v1641_v44, 4 }
  0xdb   : > { %1181 = vrot.lane.b32.xlu1 %v1138_v11, %s2462_s24  ;;  %v1276_v11 = vsel %vm2621_vm14, %v1274_v27, %v3713_v5  ;;  %v1446_v45 = vrot.slane %v1444_v54, 4  ;;  %v1445_v0 = vsel %vm2931_vm5, %v1436_v8, %v1444_v54  ;;  %v1649_v54 = vrot.slane %v1647_v26, 4 }
  0xdc   : > { %v1162_v19 = vpop.permute.xlu0 %1161  ;;  %v1454_v4 = vor.u32 %v1453_v30, %v1450_v12 }
  0xdd   : > { %1205 = vst.msk [vmem:[#allocation2 + $0x8] sm:$0xf] %vm3671_vm3, %v1162_v19  ;;  %v1176_v15 = vpop.permute.xlu1 %1175  ;;  %v1506_v19 = vrot.slane %v3072_v41, 4 }
  0xde   : > { %1171 = vrot.lane.b32.xlu0 %v1093_v50, %s2462_s24  ;;  %1212 = vst.msk [vmem:[#allocation2 + $0x24] sm:$0xf] %vm3671_vm3, %v1176_v15  ;;  %v1510_v50 = vrot.slane %v1508_v56, 5  ;;  %v1455_v35 = vsel %vm2931_vm5, %v1446_v45, %v1454_v4  ;;  %v1456_v39 = vrot.slane %v1454_v4, 4  ;;  %v1589_v4 = vld [vmem:[#allocation2 + $0x38] sm:$0x7] }
  0xdf   : > { %1304 = vrot.lane.b32.xlu1 %v1267_v63, %s2459_s21 }
  0xe0   : > { %v1174_v33 = vpop.permute.xlu0 %1173  ;;  %v1514_v21 = vor.u32 %v1513_v6, %v1510_v50  ;;  %v1465_v52 = vsel %vm2931_vm5, %v1456_v39, %v2965_v55 }
  0xe1   : > { %1211 = vst.msk [vmem:[#allocation2 + $0x20] sm:$0xf] %vm3671_vm3, %v1174_v33  ;;  %v1299_v3 = vpop.permute.xlu1 %1298  ;;  %v1642_v33 = vsel %vm2993_vm12, %v1640_v22, %v1641_v44 }
  0xe2   : > { %1183 = vrot.lane.b32.xlu0 %v1147_v20, %s2462_s24  ;;  %1343 = vst.msk [vmem:[#allocation2 + $0x4] sm:$0xf] %vm3670_vm7, %v1299_v3  ;;  %v1515_v41 = vsel %vm2931_vm5, %v1506_v19, %v1514_v21  ;;  %v1516_v48 = vrot.slane %v1514_v21, 4  ;;  %v1606_v3 = vld [vmem:[%s2507_s20 + $0x44] sm:$0xf] }
  0xe3   : > { %1308 = vrot.lane.b32.xlu1 %v1273_v47, %s2459_s21  ;;  %v1646_v47 = vrot.slane %v1644_v62, 4  ;;  %v1668_v37 = vrot.slane %v1606_v3, 6 }
  0xe4   : > { %v1297_v46 = vpop.permute.xlu0 %1296  ;;  %v1525_v55 = vsel %vm2931_vm5, %v1516_v48, %v2998_v51  ;;  %v1645_v51 = vsel %vm2993_vm12, %v1643_v14, %v1644_v62 }
  0xe5   : > { %1342 = vst.msk [vmem:[#allocation2] sm:$0xf] %vm3670_vm7, %v1297_v46  ;;  %v1180_v38 = vpop.permute.xlu1 %1179  ;;  %v1648_v53 = vsel %vm2993_vm12, %v1646_v47, %v1647_v26  ;;  %v1607_v46 = vld [vmem:[%s2507_s20 + $0x48] sm:$0x1] }
  0xe6   : > { %1306 = vrot.lane.b32.xlu0 %v1270_v2, %s2459_s21  ;;  %1214 = vst.msk [vmem:[#allocation2 + $0x2c] sm:$0xf] %vm3671_vm3, %v1180_v38  ;;  %v1664_v2 = vrot.slane %v1662_v36, 4  ;;  %v1670_v36 = vrot.slane %v1668_v37, 4  ;;  %v1671_v56 = vrot.slane %v1607_v46, 6  ;;  %v3716_v38 = vrot.slane %v3040_v29, 6 }
  0xe7   : > { %1320 = vrot.lane.b32.xlu1 %v1291_v43, %s2459_s21  ;;  %v1665_v43 = vrot.slane %v1605_v24, 6 }
  0xe8   : > { %v1178_v57 = vpop.permute.xlu0 %1177  ;;  %v1651_v5 = vsel %vm2993_vm12, %v1649_v54, %v3716_v38  ;;  %v1672_v23 = vsel %vm2993_vm12, %v1670_v36, %v1671_v56 }
  0xe9   : > { %1213 = vst.msk [vmem:[#allocation2 + $0x28] sm:$0xf] %vm3671_vm3, %v1178_v57  ;;  %v1303_v63 = vpop.permute.xlu1 %1302  ;;  %v1666_v18 = vsel %vm2993_vm12, %v1664_v2, %v1665_v43 }
  0xea   : > { %1310 = vrot.lane.b32.xlu0 %v1276_v11, %s2459_s21  ;;  %1345 = vst.msk [vmem:[#allocation2 + $0xc] sm:$0xf] %vm3670_vm7, %v1303_v63  ;;  %v1667_v11 = vrot.slane %v1665_v43, 4 }
  0xeb   : > { %1535 = vrot.lane.b32.xlu1 %v1435_v58, %s2465_s27 }
  0xec   : > { %v1301_v49 = vpop.permute.xlu0 %1300  ;;  %v1669_v29 = vsel %vm2993_vm12, %v1667_v11, %v1668_v37 }
  0xed   : > { %1344 = vst.msk [vmem:[#allocation2 + $0x8] sm:$0xf] %vm3670_vm7, %v1301_v49  ;;  %v1315_v28 = vpop.permute.xlu1 %1314 }
  0xee   : > { %1322 = vrot.lane.b32.xlu0 %v1294_v9, %s2459_s21  ;;  %1351 = vst.msk [vmem:[#allocation2 + $0x24] sm:$0xf] %vm3670_vm7, %v1315_v28 }
  0xef   : > { %1539 = vrot.lane.b32.xlu1 %v1455_v35, %s2465_s27 }
  0xf0   : > { %v1313_v15 = vpop.permute.xlu0 %1312 }
  0xf1   : > { %1350 = vst.msk [vmem:[#allocation2 + $0x20] sm:$0xf] %vm3670_vm7, %v1313_v15  ;;  %v1530_v20 = vpop.permute.xlu1 %1529 }
  0xf2   : > { %1537 = vrot.lane.b32.xlu0 %v1445_v0, %s2465_s27  ;;  %1574 = vst.msk [vmem:[#allocation2 + $0x4] sm:$0xf] %vm1572_vm8, %v1530_v20 }
  0xf3   : > { %1551 = vrot.lane.b32.xlu1 %v1515_v41, %s2465_s27 }
  0xf4   : > { %v1528_v60 = vpop.permute.xlu0 %1527 }
  0xf5   : > { %1573 = vst.msk [vmem:[#allocation2] sm:$0xf] %vm1572_vm8, %v1528_v60  ;;  %v1319_v40 = vpop.permute.xlu1 %1318 }
  0xf6   : > { %1541 = vrot.lane.b32.xlu0 %v1465_v52, %s2465_s27  ;;  %1353 = vst.msk [vmem:[#allocation2 + $0x2c] sm:$0xf] %vm3670_vm7, %v1319_v40 }
  0xf7   : > { %1681 = vrot.lane.b32.xlu1 %v1642_v33, %s2466_s30 }
  0xf8   : > { %v1317_v27 = vpop.permute.xlu0 %1316 }
  0xf9   : > { %1352 = vst.msk [vmem:[#allocation2 + $0x28] sm:$0xf] %vm3670_vm7, %v1317_v27  ;;  %v1534_v12 = vpop.permute.xlu1 %1533  ;;  %vm1587_vm7 = vcmask 453000  }
  0xfa   : > { %1553 = vrot.lane.b32.xlu0 %v1525_v55, %s2465_s27  ;;  %1576 = vst.msk [vmem:[#allocation2 + $0xc] sm:$0xf] %vm1572_vm8, %v1534_v12  ;;  %vm1588_vm3 = vmand %vm1587_vm7, %vm3673_vm0  ;;  %vm3672_vm7 = vcmask 515072   ;;  %vm3722_vm0 = vcmask 396624  }
  0xfb   : > { %1685 = vrot.lane.b32.xlu1 %v1648_v53, %s2466_s30 }
  0xfc   : > { %v1532_v30 = vpop.permute.xlu0 %1531 }
  0xfd   : > { %1575 = vst.msk [vmem:[#allocation2 + $0x8] sm:$0xf] %vm1572_vm8, %v1532_v30  ;;  %v1546_v1 = vpop.permute.xlu1 %1545 }
  0xfe   : > { %1683 = vrot.lane.b32.xlu0 %v1645_v51, %s2466_s30  ;;  %1582 = vst.msk [vmem:[#allocation2 + $0x24] sm:$0xf] %vm1572_vm8, %v1546_v1 }
  0xff   : > { %1697 = vrot.lane.b32.xlu1 %v1666_v18, %s2466_s30 }
 0x100   : > { %v1544_v58 = vpop.permute.xlu0 %1543 }
 0x101   : > { %1581 = vst.msk [vmem:[#allocation2 + $0x20] sm:$0xf] %vm1572_vm8, %v1544_v58  ;;  %v1674_v57 = vpop.permute.xlu1 %1673 }
 0x102   : > { %1687 = vrot.lane.b32.xlu0 %v1651_v5, %s2466_s30  ;;  %1719 = vst.msk [vmem:[#allocation2] sm:$0xf] %vm1718_vm4, %v1674_v57 }
 0x103   : > { %1701 = vrot.lane.b32.xlu1 %v1672_v23, %s2466_s30 }
 0x104   : > { %v1556_v45 = vpop.permute.xlu0 %1555 }
 0x105   : > { %v1590_v50 = vsel %vm1588_vm3, %v1556_v45, %v1589_v4  ;;  %v413_v6 = vpop.permute.xlu1 %412 }
 0x106   : > { %1591 = vst [vmem:[#allocation2 + $0x38] sm:$0x7] %v1590_v50  ;;  %1699 = vrot.lane.b32.xlu0 %v1669_v29, %s2466_s30  ;;  %454 = vst.msk [vmem:[#allocation2 + $0x10] sm:$0xf] %vm449_vm1, %v413_v6 }
 0x108   : > { %v1676_v63 = vpop.permute.xlu0 %1675 }
 0x109   : > { %1720 = vst.msk [vmem:[#allocation2 + $0x4] sm:$0xf] %vm1718_vm4, %v1676_v63  ;;  %v1548_v25 = vpop.permute.xlu1 %1547 }
 0x10a   : > { %1583 = vst.msk [vmem:[#allocation2 + $0x28] sm:$0xf] %vm1572_vm8, %v1548_v25 }
 0x10c   : > { %v415_v9 = vpop.permute.xlu0 %414 }
 0x10d   : > { %455 = vst.msk [vmem:[#allocation2 + $0x14] sm:$0xf] %vm449_vm1, %v415_v9  ;;  %v1678_v8 = vpop.permute.xlu1 %1677 }
 0x10e   : > { %1721 = vst.msk [vmem:[#allocation2 + $0x8] sm:$0xf] %vm1718_vm4, %v1678_v8  ;;  %v1735_v8 = vld [vmem:[#allocation2 + $0x38] sm:$0x7] }
 0x110   : > { %v1550_v49 = vpop.permute.xlu0 %1549  ;;  %v2439_v35 = vld [vmem:[#allocation2] sm:$0xff]  }
 0x111   : > { %1584 = vst.msk [vmem:[#allocation2 + $0x2c] sm:$0xf] %vm1572_vm8, %v1550_v49  ;;  %v1690_v19 = vpop.permute.xlu1 %1689  ;;  %2394 = vmatprep.mubr.msk.bf16.mxu0 %vm3672_vm7, %v2439_v35 }
 0x112   : > { %1727 = vst.msk [vmem:[#allocation2 + $0x20] sm:$0xf] %vm1718_vm4, %v1690_v19 }
 0x114   : > { %v1680_v21 = vpop.permute.xlu0 %1679 }
 0x115   : > { %1722 = vst.msk [vmem:[#allocation2 + $0xc] sm:$0xf] %vm1718_vm4, %v1680_v21  ;;  %v417_v28 = vpop.permute.xlu1 %416 }
 0x116   : > { %456 = vst.msk [vmem:[#allocation2 + $0x18] sm:$0xf] %vm449_vm1, %v417_v28 }
 0x118   : > { %v1692_v32 = vpop.permute.xlu0 %1691 }
 0x119   : > { %1728 = vst.msk [vmem:[#allocation2 + $0x24] sm:$0xf] %vm1718_vm4, %v1692_v32  ;;  %v429_v59 = vpop.permute.xlu1 %428 }
 0x11a   : > { %462 = vst.msk [vmem:[#allocation2 + $0x30] sm:$0xf] %vm449_vm1, %v429_v59  ;;  %v3520_v59 = vld [vmem:[%s3653_s2] ss:$0 sm:$0xff] }
 0x11c   : > { %v419_v0 = vpop.permute.xlu0 %418  ;;  %v2442_v39 = vld [vmem:[#allocation2 + $0x8] sm:$0xff]  }
 0x11d   : > { %457 = vst.msk [vmem:[#allocation2 + $0x1c] sm:$0xf] %vm449_vm1, %v419_v0  ;;  %v555_v15 = vpop.permute.xlu1 %554  ;;  %2395 = vmatmul.mubr.msk.bf16.vlgmr.msra.gmra.mrb[0].mxu0 %vm3672_vm7, %v2442_v39  ;;  %v3526_v0 = vld [vmem:[%s3654_s3] ss:$0 sm:$0xff] }
 0x11e   : > { %596 = vst.msk [vmem:[#allocation2 + $0x10] sm:$0xf] %vm591_vm13, %v555_v15 }
 0x120   : > { %v431_v41 = vpop.permute.xlu0 %430  ;;  %v2443_v13 = vld [vmem:[#allocation2 + $0x20] sm:$0xff]  }
 0x121   : > { %463 = vst.msk [vmem:[#allocation2 + $0x34] sm:$0xf] %vm449_vm1, %v431_v41  ;;  %v1694_v22 = vpop.permute.xlu1 %1693  ;;  %2402 = vmatprep.mubr.msk.bf16.mxu1 %vm3672_vm7, %v2443_v13  ;;  %vm3717_vm1 = vcmask 339224  }
 0x122   : > { %1729 = vst.msk [vmem:[#allocation2 + $0x28] sm:$0xf] %vm1718_vm4, %v1694_v22  ;;  %vm3720_vm3 = vmmov %vm3717_vm1 }
 0x124   : > { %v557_v44 = vpop.permute.xlu0 %556 }
 0x125   : > { %597 = vst.msk [vmem:[#allocation2 + $0x14] sm:$0xf] %vm591_vm13, %v557_v44  ;;  %v559_v62 = vpop.permute.xlu1 %558 }
 0x126   : > { %598 = vst.msk [vmem:[#allocation2 + $0x18] sm:$0xf] %vm591_vm13, %v559_v62 }
 0x128   : > { %v1696_v20 = vpop.permute.xlu0 %1695 }
 0x129   : > { %1730 = vst.msk [vmem:[#allocation2 + $0x2c] sm:$0xf] %vm1718_vm4, %v1696_v20  ;;  %v571_v34 = vpop.permute.xlu1 %570 }
 0x12a   : > { %604 = vst.msk [vmem:[#allocation2 + $0x30] sm:$0xf] %vm591_vm13, %v571_v34 }
 0x12c   : > { %v561_v52 = vpop.permute.xlu0 %560 }
 0x12d   : > { %599 = vst.msk [vmem:[#allocation2 + $0x1c] sm:$0xf] %vm591_vm13, %v561_v52  ;;  %v797_v48 = vpop.permute.xlu1 %796 }
 0x12e   : > { %838 = vst.msk [vmem:[#allocation2 + $0x10] sm:$0xf] %vm833_vm15, %v797_v48 }
 0x130   : > { %v573_v60 = vpop.permute.xlu0 %572  ;;  %v2444_v33 = vld [vmem:[#allocation2 + $0x28] sm:$0xff]  }
 0x131   : > { %605 = vst.msk [vmem:[#allocation2 + $0x34] sm:$0xf] %vm591_vm13, %v573_v60  ;;  %v801_v47 = vpop.permute.xlu1 %800  ;;  %2403 = vmatmul.mubr.msk.bf16.vlgmr.msra.gmra.mrb[0].mxu1 %vm3672_vm7, %v2444_v33  ;;  %vm3718_vm13 = vmmov %vm3717_vm1 }
 0x132   : > { %840 = vst.msk [vmem:[#allocation2 + $0x18] sm:$0xf] %vm833_vm15, %v801_v47  ;;  %vm3721_vm7 = vmmov %vm3717_vm1 }
 0x134   : > { %v799_v26 = vpop.permute.xlu0 %798 }
 0x135   : > { %839 = vst.msk [vmem:[#allocation2 + $0x14] sm:$0xf] %vm833_vm15, %v799_v26  ;;  %v813_v40 = vpop.permute.xlu1 %812 }
 0x136   : > { %846 = vst.msk [vmem:[#allocation2 + $0x30] sm:$0xf] %vm833_vm15, %v813_v40  ;;  %v2004_v40 = vld [vmem:[%s3536_s16 + $0x4] sm:$0x3] }
 0x138   : > { %v803_v24 = vpop.permute.xlu0 %802 }
 0x139   : > { %841 = vst.msk [vmem:[#allocation2 + $0x1c] sm:$0xf] %vm833_vm15, %v803_v24  ;;  %v943_v3 = vpop.permute.xlu1 %942 }
 0x13a   : > { %984 = vst.msk [vmem:[#allocation2 + $0x10] sm:$0xf] %vm979_vm2, %v943_v3 }
 0x13c   : > { %v815_v55 = vpop.permute.xlu0 %814 }
 0x13d   : > { %847 = vst.msk [vmem:[#allocation2 + $0x34] sm:$0xf] %vm833_vm15, %v815_v55  ;;  %v947_v14 = vpop.permute.xlu1 %946  ;;  %vm3719_vm15 = vmmov %vm3717_vm1 }
 0x13e   : > { %986 = vst.msk [vmem:[#allocation2 + $0x18] sm:$0xf] %vm979_vm2, %v947_v14 }
 0x140   : > { %v945_v27 = vpop.permute.xlu0 %944 }
 0x141   : > { %985 = vst.msk [vmem:[#allocation2 + $0x14] sm:$0xf] %vm979_vm2, %v945_v27  ;;  %v959_v53 = vpop.permute.xlu1 %958 }
 0x142   : > { %992 = vst.msk [vmem:[#allocation2 + $0x30] sm:$0xf] %vm979_vm2, %v959_v53 }
 0x144   : > { %v949_v2 = vpop.permute.xlu0 %948 }
 0x145   : > { %987 = vst.msk [vmem:[#allocation2 + $0x1c] sm:$0xf] %vm979_vm2, %v949_v2  ;;  %v1166_v43 = vpop.permute.xlu1 %1165 }
 0x146   : > { %1207 = vst.msk [vmem:[#allocation2 + $0x10] sm:$0xf] %vm3717_vm1, %v1166_v43  ;;  %v2309_v43 = vld [vmem:[%s3536_s16 + $0xc] sm:$0x3] }
 0x148   : > { %v961_v37 = vpop.permute.xlu0 %960 }
 0x149   : > { %993 = vst.msk [vmem:[#allocation2 + $0x34] sm:$0xf] %vm979_vm2, %v961_v37  ;;  %v1170_v12 = vpop.permute.xlu1 %1169  ;;  %vm3723_vm2 = vmmov %vm3722_vm0 }
 0x14a   : > { %1209 = vst.msk [vmem:[#allocation2 + $0x18] sm:$0xf] %vm3718_vm13, %v1170_v12  ;;  %vm3724_vm13 = vmmov %vm3722_vm0 }
 0x14c   : > { %v1168_v46 = vpop.permute.xlu0 %1167 }
 0x14d   : > { %1208 = vst.msk [vmem:[#allocation2 + $0x14] sm:$0xf] %vm3719_vm15, %v1168_v46  ;;  %v1182_v51 = vpop.permute.xlu1 %1181  ;;  %vm3725_vm15 = vmmov %vm3722_vm0 }
 0x14e   : > { %1215 = vst.msk [vmem:[#allocation2 + $0x30] sm:$0xf] %vm3720_vm3, %v1182_v51  ;;  %vm3726_vm3 = vmmov %vm3722_vm0 }
 0x150   : > { %v1172_v54 = vpop.permute.xlu0 %1171 }
 0x151   : > { %1210 = vst.msk [vmem:[#allocation2 + $0x1c] sm:$0xf] %vm3721_vm7, %v1172_v54  ;;  %v1305_v30 = vpop.permute.xlu1 %1304  ;;  %vm1733_vm7 = vcmask 510400  }
 0x152   : > { %1346 = vst.msk [vmem:[#allocation2 + $0x10] sm:$0xf] %vm3722_vm0, %v1305_v30 }
 0x154   : > { %v1184_v18 = vpop.permute.xlu0 %1183 }
 0x155   : > { %1216 = vst.msk [vmem:[#allocation2 + $0x34] sm:$0xf] %vm3717_vm1, %v1184_v18  ;;  %v1309_v36 = vpop.permute.xlu1 %1308  ;;  %vm3727_vm1 = vsmask.f32 2304 }
 0x156   : > { %1348 = vst.msk [vmem:[#allocation2 + $0x18] sm:$0xf] %vm3723_vm2, %v1309_v36  ;;  %vm1734_vm2 = vmand %vm1733_vm7, %vm3727_vm1  ;;  %vm3732_vm7 = vsmask.f32 1280 }
 0x158   : > { %v1307_v56 = vpop.permute.xlu0 %1306 }
 0x159   : > { %1347 = vst.msk [vmem:[#allocation2 + $0x14] sm:$0xf] %vm3724_vm13, %v1307_v56  ;;  %v1321_v1 = vpop.permute.xlu1 %1320 }
 0x15a   : > { %1354 = vst.msk [vmem:[#allocation2 + $0x30] sm:$0xf] %vm3725_vm15, %v1321_v1 }
 0x15c   : > { %v1311_v38 = vpop.permute.xlu0 %1310 }
 0x15d   : > { %1349 = vst.msk [vmem:[#allocation2 + $0x1c] sm:$0xf] %vm3726_vm3, %v1311_v38  ;;  %v1536_v5 = vpop.permute.xlu1 %1535 }
 0x15e   : > { %1577 = vst.msk [vmem:[#allocation2 + $0x10] sm:$0xf] %vm1572_vm8, %v1536_v5 }
 0x160   : > { %v1323_v11 = vpop.permute.xlu0 %1322 }
 0x161   : > { %1355 = vst.msk [vmem:[#allocation2 + $0x34] sm:$0xf] %vm3722_vm0, %v1323_v11  ;;  %v1540_v58 = vpop.permute.xlu1 %1539  ;;  %vm2000_vm0 = vcmask 35840  }
 0x162   : > { %1579 = vst.msk [vmem:[#allocation2 + $0x18] sm:$0xf] %vm1572_vm8, %v1540_v58 }
 0x164   : > { %v1538_v23 = vpop.permute.xlu0 %1537 }
 0x165   : > { %1578 = vst.msk [vmem:[#allocation2 + $0x14] sm:$0xf] %vm1572_vm8, %v1538_v23  ;;  %v1552_v57 = vpop.permute.xlu1 %1551 }
 0x166   : > { %1585 = vst.msk [vmem:[#allocation2 + $0x30] sm:$0xf] %vm1572_vm8, %v1552_v57 }
 0x168   : > { %v1542_v29 = vpop.permute.xlu0 %1541 }
 0x169   : > { %1580 = vst.msk [vmem:[#allocation2 + $0x1c] sm:$0xf] %vm1572_vm8, %v1542_v29  ;;  %v1682_v45 = vpop.permute.xlu1 %1681 }
 0x16a   : > { %1723 = vst.msk [vmem:[#allocation2 + $0x10] sm:$0xf] %vm1718_vm4, %v1682_v45 }
 0x16c   : > { %v1554_v4 = vpop.permute.xlu0 %1553 }
 0x16d   : > { %1586 = vst.msk [vmem:[#allocation2 + $0x34] sm:$0xf] %vm1572_vm8, %v1554_v4  ;;  %v1686_v50 = vpop.permute.xlu1 %1685  ;;  %vm3728_vm8 = vcmask 515072  }
 0x16e   : > { %1725 = vst.msk [vmem:[#allocation2 + $0x18] sm:$0xf] %vm1718_vm4, %v1686_v50  ;;  %vm3729_vm13 = vmmov %vm3728_vm8 }
 0x16f   : > { %vm3730_vm15 = vmmov %vm3728_vm8 }
 0x170   : > { %v1684_v6 = vpop.permute.xlu0 %1683  ;;  %vm3731_vm3 = vmmov %vm3728_vm8 }
 0x171   : > { %1724 = vst.msk [vmem:[#allocation2 + $0x14] sm:$0xf] %vm1718_vm4, %v1684_v6  ;;  %v1698_v63 = vpop.permute.xlu1 %1697 }
 0x172   : > { %1731 = vst.msk [vmem:[#allocation2 + $0x30] sm:$0xf] %vm1718_vm4, %v1698_v63 }
 0x174   : > { %v1688_v25 = vpop.permute.xlu0 %1687 }
 0x175   : > { %1726 = vst.msk [vmem:[#allocation2 + $0x1c] sm:$0xf] %vm1718_vm4, %v1688_v25  ;;  %v1702_v9 = vpop.permute.xlu1 %1701 }
 0x176   : > { %v1736_v49 = vsel %vm1734_vm2, %v1702_v9, %v1735_v8 }
 0x177   : > { %1737 = vst [vmem:[#allocation2 + $0x38] sm:$0x7] %v1736_v49 }
 0x178   : > { %v1700_v35 = vpop.permute.xlu0 %1699  ;;  %v2445_v19 = vld [vmem:[#allocation2 + $0x10] sm:$0xff]  }
 0x179   : > { %1732 = vst.msk [vmem:[#allocation2 + $0x34] sm:$0xf] %vm1718_vm4, %v1700_v35  ;;  %2398 = vmatprep.mubr.msk.bf16.mxu0 %vm3728_vm8, %v2445_v19  ;;  %vm2002_vm4 = vcmask 33792   ;;  %v2340_v19 = vld [vmem:[%s3536_s16 + $0x34] sm:$0x3] }
 0x17a   : > { %vm3542_vm1 = vmand %vm2002_vm4, %vm3732_vm7 }
 0x17c   : > { %v2446_v21 = vld [vmem:[#allocation2 + $0x18] sm:$0xff]  }
 0x17d   : > { %2399 = vmatmul.mubr.msk.bf16.gmra.mrb[4].mxu0 %vm3729_vm13, %v2446_v21 }
 0x17e   : > { %v2448_v28 = vld [vmem:[#allocation2 + $0x38] ss:$0 sps:$4 sm:$0x77]  }
 0x180   : > { %v2447_v32 = vld [vmem:[#allocation2 + $0x30] sm:$0xff]  }
 0x181   : > { %2406 = vmatprep.mubr.msk.bf16.mxu1 %vm3730_vm15, %v2447_v32 }
 0x182   : > { %2407 = vmatmul.mubr.msk.bf16.gmra.mrb[4].mxu1 %vm3731_vm3, %v2448_v28 }
 0x1f0   : > { %v2396_v39 = vpop.f32.mrb[0].mxu0 }
 0x1f1   : > { %v1958_v15 = vmul.f32 %v2396_v39, %v3520_v59  ;;  %v1888_v41 = vpop.f32.mrb[1].mxu0 }
 0x1f2   : > { %v1956_v13 = vmul.f32 %v3520_v59, %v1888_v41  ;;  %v3530_v22 = vpop.f32.mrb[2].mxu0 }
 0x1f3   : > { %v1979_v44 = vadd.f32 %v3526_v0, %v1958_v15  ;;  %v1891_v62 = vpop.f32.mrb[3].mxu0 }
 0x1f4   : > { %v1977_v20 = vadd.f32 %v3526_v0, %v1956_v13  ;;  %v1957_v34 = vmul.f32 %v3520_v59, %v1891_v62 }
 0x1f5   : > { %v2357_v52 = vpack.c.bf16 %v1979_v44, %v1979_v44 }
 0x1f6   : > { %v2354_v48 = vpack.c.bf16 %v1977_v20, %v1977_v20  ;;  %v1978_v60 = vadd.f32 %v3526_v0, %v1957_v34 }
 0x1f7   : > { %v2023_v47 = vshrl.u32 %v2357_v52, 16  ;;  %v2026_v26 = vshll.u32 %v2357_v52, 16 }
 0x1f8   : > { %2001 = vst.msk [vmem:[%s3536_s16] sm:$0xf] %vm2000_vm0, %v2354_v48  ;;  %v2355_v24 = vpack.c.bf16 %v1978_v60, %v1978_v60  ;;  %v2333_v60 = vld [vmem:[%s3536_s16 + $0x2c] sm:$0x3] }
 0x1f9   : > { %v2025_v3 = vrot.slane %v2023_v47, 6  ;;  %v2028_v55 = vrot.slane %v2026_v26, 7 }
 0x1fa   : > { %v2005_v14 = vsel %vm3542_vm1, %v2355_v24, %v2004_v40  ;;  %v2014_v27 = vshrl.u32 %v2355_v24, 16  ;;  %v2017_v53 = vshll.u32 %v2355_v24, 16  ;;  %v1959_v24 = vmul.f32 %v3530_v22, %v3520_v59 }
 0x1fb   : > { %v2029_v2 = vor.u32 %v2028_v55, %v2025_v3  ;;  %2006 = vst [vmem:[%s3536_s16 + $0x4] sm:$0x3] %v2005_v14 }
 0x1fc   : > { %v2016_v37 = vrot.slane %v2014_v27, 6  ;;  %v2019_v12 = vrot.slane %v2017_v53, 7  ;;  %v1980_v7 = vadd.f32 %v3526_v0, %v1959_v24 }
 0x1fd   : > { %v2031_v46 = vrot.slane %v2029_v2, 4 }
 0x1fe   : > { %v2020_v51 = vor.u32 %v2019_v12, %v2016_v37  ;;  %v2358_v55 = vpack.c.bf16 %v1980_v7, %v1980_v7 }
 0x1ff   : > { %v2037_v54 = vsel %vm3542_vm1, %v2031_v46, %v2309_v43 }
 0x200   : > { %2310 = vst [vmem:[%s3536_s16 + $0xc] sm:$0x3] %v2037_v54  ;;  %v2021_v30 = vrot.slane %v2020_v51, 4  ;;  %v2313_v51 = vrot.slane %v2358_v55, 9 }
 0x202   : > { %v2030_v18 = vsel %vm2560_vm10, %v2021_v30, %v2029_v2 }
 0x203   : > { %2308 = vst.msk [vmem:[%s3536_s16 + $0x8] sm:$0xf] %vm2000_vm0, %v2030_v18 }
 0x204   : > { %v2404_v36 = vpop.f32.mrb[0].mxu1 }
 0x205   : > { %v1966_v56 = vmul.f32 %v2404_v36, %v3520_v59  ;;  %v1920_v1 = vpop.f32.mrb[1].mxu1 }
 0x206   : > { %v1964_v38 = vmul.f32 %v3520_v59, %v1920_v1  ;;  %v2405_v5 = vpop.f32.mrb[2].mxu1 }
 0x207   : > { %v1987_v11 = vadd.f32 %v3526_v0, %v1966_v56  ;;  %v1967_v58 = vmul.f32 %v2405_v5, %v3520_v59  ;;  %v1923_v23 = vpop.f32.mrb[3].mxu1 }
 0x208   : > { %v1985_v57 = vadd.f32 %v3526_v0, %v1964_v38  ;;  %v1965_v42 = vmul.f32 %v3520_v59, %v1923_v23 }
 0x209   : > { %v2368_v29 = vpack.c.bf16 %v1987_v11, %v1987_v11  ;;  %v1988_v45 = vadd.f32 %v3526_v0, %v1967_v58 }
 0x20a   : > { %v2365_v4 = vpack.c.bf16 %v1985_v57, %v1985_v57  ;;  %v1986_v50 = vadd.f32 %v3526_v0, %v1965_v42 }
 0x20b   : > { %v2158_v6 = vrot.slane %v2368_v29, 7  ;;  %v3568_v63 = vpack.c.bf16 %v1988_v45, %v1988_v45 }
 0x20c   : > { %v2121_v25 = vshrl.u32 %v2365_v4, 16  ;;  %v2124_v9 = vshll.u32 %v2365_v4, 16  ;;  %v2366_v8 = vpack.c.bf16 %v1986_v50, %v1986_v50 }
 0x20d   : > { %v2160_v49 = vrot.slane %v2158_v6, 4  ;;  %v2161_v35 = vrot.slane %v3568_v63, 7  ;;  %v2177_v2 = vshrl.u32 %v3568_v63, 16  ;;  %v2180_v36 = vshll.u32 %v3568_v63, 16 }
 0x20e   : > { %v2123_v21 = vrot.slane %v2121_v25, 4  ;;  %v2126_v28 = vrot.slane %v2124_v9, 5  ;;  %v2130_v32 = vshll.u32 %v2366_v8, 16  ;;  %v2134_v39 = vshrl.u32 %v2366_v8, 16  ;;  %v2315_v25 = vld [vmem:[%s3536_s16 + $0x14] sm:$0x3] }
 0x20f   : > { %v2162_v15 = vsel %vm2522_vm6, %v2160_v49, %v2161_v35  ;;  %v2338_v41 = vrot.slane %v2366_v8, 11  ;;  %v2179_v11 = vrot.slane %v2177_v2, 5  ;;  %v2182_v35 = vrot.slane %v2180_v36, 6 }
 0x210   : > { %v2127_v13 = vor.u32 %v2126_v28, %v2123_v21  ;;  %v2168_v44 = vsel %vm3542_vm1, %v2162_v15, %v2340_v19  ;;  %v2132_v62 = vrot.slane %v2130_v32, 5  ;;  %v2136_v20 = vrot.slane %v2134_v39, 4  ;;  %v2328_v28 = vld [vmem:[%s3536_s16 + $0x24] sm:$0x3] }
 0x211   : > { %2341 = vst [vmem:[%s3536_s16 + $0x34] sm:$0x3] %v2168_v44  ;;  %v2159_v34 = vsel %vm2522_vm6, %v2338_v41, %v2158_v6  ;;  %v2350_v44 = vld [vmem:[%s3536_s16 + $0x44] sm:$0x3]  ;;  %v2183_v7 = vor.u32 %v2182_v35, %v2179_v11 }
 0x212   : > { %v2128_v52 = vrot.slane %v2127_v13, 4  ;;  %v2137_v48 = vor.u32 %v2136_v20, %v2132_v62  ;;  %2339 = vst.msk [vmem:[%s3536_s16 + $0x30] sm:$0xf] %vm2000_vm0, %v2159_v34 }
 0x214   : > { %v2133_v47 = vsel %vm2581_vm11, %v2128_v52, %v2132_v62  ;;  %v2138_v26 = vrot.slane %v2137_v48, 4 }
 0x215   : > { %2332 = vst.msk [vmem:[%s3536_s16 + $0x28] sm:$0xf] %vm2000_vm0, %v2133_v47 }
 0x216   : > { %v2144_v40 = vsel %vm3542_vm1, %v2138_v26, %v2333_v60  ;;  %v2322_v26 = vld [vmem:[%s3536_s16 + $0x1c] sm:$0x3] }
 0x217   : > { %2334 = vst [vmem:[%s3536_s16 + $0x2c] sm:$0x3] %v2144_v40 }
 0x250   : > { %v2400_v3 = vpop.f32.mrb[4].mxu0 }
 0x251   : > { %v1962_v14 = vmul.f32 %v2400_v3, %v3520_v59  ;;  %v1904_v27 = vpop.f32.mrb[5].mxu0 }
 0x252   : > { %v1960_v10 = vmul.f32 %v3520_v59, %v1904_v27  ;;  %v2401_v53 = vpop.f32.mrb[6].mxu0 }
 0x253   : > { %v1983_v43 = vadd.f32 %v3526_v0, %v1962_v14  ;;  %v1963_v37 = vmul.f32 %v2401_v53, %v3520_v59  ;;  %v1907_v12 = vpop.f32.mrb[7].mxu0 }
 0x254   : > { %v1981_v46 = vadd.f32 %v3526_v0, %v1960_v10  ;;  %v1961_v22 = vmul.f32 %v3520_v59, %v1907_v12  ;;  %v2345_v12 = vld [vmem:[%s3536_s16 + $0x3c] sm:$0x3] }
 0x255   : > { %v2362_v54 = vpack.c.bf16 %v1983_v43, %v1983_v43  ;;  %v1984_v30 = vadd.f32 %v3526_v0, %v1963_v37  ;;  %v2408_v18 = vpop.f32.mrb[4].mxu1  ;;  %v2184_v43 = vrot.slane %v2183_v7, 4 }
 0x256   : > { %v2359_v56 = vpack.c.bf16 %v1981_v46, %v1981_v46  ;;  %v1982_v1 = vadd.f32 %v3526_v0, %v1961_v22  ;;  %v1970_v38 = vmul.f32 %v2408_v18, %v3520_v59  ;;  %v1936_v5 = vpop.f32.mrb[5].mxu1 }
 0x257   : > { %v2082_v58 = vshrl.u32 %v2362_v54, 16  ;;  %v2326_v23 = vrot.slane %v2362_v54, 10  ;;  %v2364_v57 = vpack.c.bf16 %v1984_v30, %v1984_v30  ;;  %v2409_v42 = vpop.f32.mrb[6].mxu1  ;;  %v1968_v8 = vmul.f32 %v3520_v59, %v1936_v5 }
 0x258   : > { %v2047_v29 = vrot.slane %v2359_v56, 5  ;;  %v2068_v45 = vshrl.u32 %v2359_v56, 16  ;;  %v2361_v4 = vpack.c.bf16 %v1982_v1, %v1982_v1  ;;  %v1991_v50 = vadd.f32 %v3526_v0, %v1970_v38  ;;  %v1939_v6 = vpop.f32.mrb[7].mxu1 }
 0x259   : > { %v2084_v63 = vrot.slane %v2082_v58, 7  ;;  %v2104_v9 = vrot.slane %v2364_v57, 6  ;;  %v1969_v49 = vmul.f32 %v3520_v59, %v1939_v6  ;;  %v2085_v39 = vshll.u32 %v2362_v54, 16 }
 0x25a   : > { %v2048_v19 = vsel %vm2621_vm14, %v2313_v51, %v2047_v29  ;;  %v2049_v21 = vrot.slane %v2047_v29, 4  ;;  %v2073_v32 = vshrl.u32 %v2361_v4, 16  ;;  %v2076_v13 = vshll.u32 %v2361_v4, 16 }
 0x25b   : > { %2314 = vst.msk [vmem:[%s3536_s16 + $0x10] sm:$0xf] %vm2000_vm0, %v2048_v19  ;;  %v2105_v15 = vsel %vm2993_vm12, %v2326_v23, %v2104_v9  ;;  %v2106_v41 = vrot.slane %v2104_v9, 4  ;;  %v2373_v62 = vpack.c.bf16 %v1991_v50, %v1991_v50  ;;  %v1989_v20 = vadd.f32 %v3526_v0, %v1968_v8 }
 0x25c   : > { %v2055_v59 = vsel %vm3542_vm1, %v2049_v21, %v2315_v25  ;;  %2327 = vst.msk [vmem:[%s3536_s16 + $0x20] sm:$0xf] %vm2000_vm0, %v2105_v15  ;;  %v2075_v61 = vrot.slane %v2073_v32, 7  ;;  %v2087_v34 = vor.u32 %v2085_v39, %v2084_v63  ;;  %v2320_v52 = vrot.slane %v2068_v45, 11 }
 0x25d   : > { %2316 = vst [vmem:[%s3536_s16 + $0x14] sm:$0x3] %v2055_v59  ;;  %v2112_v17 = vsel %vm3542_vm1, %v2106_v41, %v2328_v28  ;;  %v1990_v48 = vadd.f32 %v3526_v0, %v1969_v49  ;;  %v2213_v40 = vsel %vm3542_vm1, %v2373_v62, %v2350_v44  ;;  %v2371_v24 = vpack.c.bf16 %v1989_v20, %v1989_v20 }
 0x25e   : > { %2329 = vst [vmem:[%s3536_s16 + $0x24] sm:$0x3] %v2112_v17  ;;  %v2078_v60 = vor.u32 %v2076_v13, %v2075_v61  ;;  %v2080_v47 = vrot.slane %v2075_v61, 4  ;;  %2351 = vst [vmem:[%s3536_s16 + $0x44] sm:$0x3] %v2213_v40 }
 0x25f   : > { %v2372_v3 = vpack.c.bf16 %v1990_v48, %v1990_v48  ;;  %v2186_v14 = vshrl.u32 %v2371_v24, 16  ;;  %v2189_v27 = vshll.u32 %v2371_v24, 16 }
 0x260   : > { %v2079_v55 = vsel %vm2546_vm9, %v2320_v52, %v2078_v60  ;;  %v2088_v0 = vsel %vm2546_vm9, %v2080_v47, %v2087_v34 }
 0x261   : > { %2321 = vst.msk [vmem:[%s3536_s16 + $0x18] sm:$0xf] %vm2000_vm0, %v2079_v55  ;;  %v2094_v10 = vsel %vm3542_vm1, %v2088_v0, %v2322_v26  ;;  %2349 = vst.msk [vmem:[%s3536_s16 + $0x40] sm:$0xf] %vm2000_vm0, %v2372_v3  ;;  %v2188_v53 = vrot.slane %v2186_v14, 5  ;;  %v2191_v2 = vrot.slane %v2189_v27, 6 }
 0x262   : > { %2323 = vst [vmem:[%s3536_s16 + $0x1c] sm:$0x3] %v2094_v10 }
 0x263   : > { %v2192_v37 = vor.u32 %v2191_v2, %v2188_v53 }
 0x265   : > { %v2193_v31 = vsel %vm2931_vm5, %v2184_v43, %v2192_v37  ;;  %v2194_v46 = vrot.slane %v2192_v37, 4 }
 0x266   : > { %2344 = vst.msk [vmem:[%s3536_s16 + $0x38] sm:$0xf] %vm2000_vm0, %v2193_v31 }
 0x267   : > { %v2200_v22 = vsel %vm3542_vm1, %v2194_v46, %v2345_v12 }
 0x268   : > { %2346 = vst [vmem:[%s3536_s16 + $0x3c] sm:$0x3] %v2200_v22 }
 0x269 PF: > { %s14_s15 = sadd.s32 1, %s2457_s15  }
 0x26a   : > { %p11_p4 = scmp.ge.s32.totalorder %s14_s15, 4  }
 0x26c   :  { %13 = sbr.rel (!%p11_p4) target bundleno = 1 (0x1), region = 74 }

</bundles_post_ra>
